<compile_context>
chip_gen: v6e
topology: v6e:2x2x1
jax: 0.10.0
libtpu: 0.0.40
codegen_flags: <defaults>
</compile_context>

<pallas_src>
import math
import functools

import jax
import jax.numpy as jnp
import numpy as np
from jax import lax
from jax.experimental import pallas as pl
from jax.experimental.pallas import tpu as pltpu

_EPS = 1e-5
_MIB = 1024 * 1024


# ---------------------------------------------------------------------------
# tiling / spec helpers
# ---------------------------------------------------------------------------
def _pick_tile(n, pref):
    """Largest tile <= pref that divides n and is a multiple of 8 (or n itself)."""
    if n <= pref:
        return n
    t = pref - (pref % 8)
    while t >= 8:
        if n % t == 0:
            return t
        t -= 8
    return n


def _pick_chunk(h):
    """Lane-aligned chunk of the MLP hidden dim (multiple of 128 when possible)."""
    for c in (512, 384, 256, 128):
        if h % c == 0:
            return c
    return h


def _const_spec(shape, single_buffer):
    """Whole-array block, constant across the grid (fetched once, DMA elided after)."""
    idx = lambda *_: (0,) * len(shape)
    if single_buffer:
        # revisited block -> one VMEM buffer is enough; halves resident weight footprint
        return pl.BlockSpec(shape, idx, pipeline_mode=pl.Buffered(buffer_count=1))
    return pl.BlockSpec(shape, idx)


def _vmem_limit(need_bytes):
    """Footprint + compiler headroom, capped below v7x's 64 MiB physical VMEM per core."""
    return int(min(max(need_bytes + 8 * _MIB, 32 * _MIB), 60 * _MIB))


# ---------------------------------------------------------------------------
# Kernel 1: LayerNorm1 + fused QKV projection, head-major outputs
#           grid: (B, T // tr)
# ---------------------------------------------------------------------------
def _ln_qkv_kernel(x_ref, g_ref, b_ref, w_ref, bqkv_ref,
                   q_ref, k_ref, v_ref, *, n_head, compute_dtype):
    C = x_ref.shape[-1]
    hd = C // n_head

    x = x_ref[0].astype(jnp.float32)                       # (tr, C)
    mu = jnp.mean(x, axis=-1, keepdims=True)
    var = jnp.mean((x - mu) ** 2, axis=-1, keepdims=True)
    h = ((x - mu) * lax.rsqrt(var + _EPS) * g_ref[...] + b_ref[...]).astype(compute_dtype)

    # one lane-dense (tr, C) @ (C, 3C) matmul on the MXU, f32 accumulation
    qkv = jnp.dot(h, w_ref[...], preferred_element_type=jnp.float32) + bqkv_ref[...]

    # head-split stores -> (B, H, T, hd) head-major HBM layout; kernel 2 then needs no
    # separate XLA transpose of q/k/v between the two pallas_calls.
    for hh in range(n_head):
        q_ref[0, hh] = qkv[:, hh * hd:(hh + 1) * hd].astype(q_ref.dtype)
        k_ref[0, hh] = qkv[:, C + hh * hd:C + (hh + 1) * hd].astype(k_ref.dtype)
        v_ref[0, hh] = qkv[:, 2 * C + hh * hd:2 * C + (hh + 1) * hd].astype(v_ref.dtype)


# ---------------------------------------------------------------------------
# Kernel 2: flash attention (batched heads) + proj + residual + LN2 + MLP + residual
#           grid: (B, T // tq, T // tk)   -- ki is the (arbitrary) reduction axis
# ---------------------------------------------------------------------------
def _attn_mlp_kernel(x_ref, q_ref, k_ref, v_ref,
                     wproj_ref, bproj_ref, g2_ref, b2_ref,
                     wfc1_ref, bfc1_ref, wfc2_ref, bfc2_ref,
                     o_ref,
                     m_sc, l_sc, acc_sc,
                     *, n_head, tq, tk, mlp_chunk, compute_dtype, approx_recip):
    qi = pl.program_id(1)
    ki = pl.program_id(2)
    C = x_ref.shape[-1]
    hd = C // n_head
    scale = 1.0 / math.sqrt(hd)

    # last key tile that overlaps the causal region of this q tile
    last_ki = ((qi + 1) * tq - 1) // tk

    @pl.when(ki == 0)
    def _init():
        m_sc[...] = jnp.full_like(m_sc, -jnp.inf)
        l_sc[...] = jnp.zeros_like(l_sc)
        acc_sc[...] = jnp.zeros_like(acc_sc)

    @pl.when(ki <= last_ki)
    def _attend():
        qh = q_ref[0]                                      # (H, tq, hd)  compute_dtype
        kh = k_ref[0]                                      # (H, tk, hd)
        vh = v_ref[0]                                      # (H, tk, hd)
        # batched over heads (leading batch dim), contraction on the last dims
        s = jnp.einsum("hqd,hkd->hqk", qh, kh,
                       preferred_element_type=jnp.float32) * scale      # (H, tq, tk) f32
        rows = qi * tq + lax.broadcasted_iota(jnp.int32, (tq, tk), 0)
        cols = ki * tk + lax.broadcasted_iota(jnp.int32, (tq, tk), 1)
        s = jnp.where((cols <= rows)[None, :, :], s, -jnp.inf)

        m_prev = m_sc[...]                                 # (H, tq, 1)
        m_new = jnp.maximum(m_prev, jnp.max(s, axis=-1, keepdims=True))
        alpha = jnp.exp(m_prev - m_new)
        p = jnp.exp(s - m_new)
        l_sc[...] = alpha * l_sc[...] + jnp.sum(p, axis=-1, keepdims=True)
        pv = jnp.einsum("hqk,hkd->hqd", p.astype(compute_dtype), vh,
                        preferred_element_type=jnp.float32)             # (H, tq, hd)
        acc_sc[...] = alpha * acc_sc[...] + pv
        m_sc[...] = m_new

    @pl.when(ki == last_ki)
    def _epilogue():
        x = x_ref[0].astype(jnp.float32)                   # (tq, C)
        inv_l = pl.reciprocal(l_sc[...], approx=approx_recip)           # EUP slot
        y = acc_sc[...] * inv_l                            # (H, tq, hd) f32

        # merge heads via lane concatenation, then ONE full-K (tq,C)@(C,C) projection
        y2d = jnp.concatenate([y[h] for h in range(n_head)], axis=-1)   # (tq, C)
        y2d = y2d.astype(compute_dtype)
        attn = jnp.dot(y2d, wproj_ref[...], preferred_element_type=jnp.float32)
        x1 = x + attn + bproj_ref[...]                     # residual 1

        mu = jnp.mean(x1, axis=-1, keepdims=True)
        var = jnp.mean((x1 - mu) ** 2, axis=-1, keepdims=True)
        h2 = ((x1 - mu) * lax.rsqrt(var + _EPS) * g2_ref[...]
              + b2_ref[...]).astype(compute_dtype)

        # MLP with the 4C hidden dim processed in lane-aligned chunks
        n_chunks = wfc1_ref.shape[-1] // mlp_chunk
        out0 = x1 + bfc2_ref[...]

        def mlp_body(j, acc):
            off = pl.multiple_of(j * mlp_chunk, mlp_chunk)
            f1 = (jnp.dot(h2, wfc1_ref[:, pl.ds(off, mlp_chunk)],
                          preferred_element_type=jnp.float32)
                  + bfc1_ref[:, pl.ds(off, mlp_chunk)])
            g = jax.nn.gelu(f1, approximate=False)         # exact erf GELU (nn.GELU default)
            return acc + jnp.dot(g.astype(compute_dtype),
                                 wfc2_ref[pl.ds(off, mlp_chunk), :],
                                 preferred_element_type=jnp.float32)

        # partial unroll keeps vreg pressure bounded when there are many chunks
        out = lax.fori_loop(0, n_chunks, mlp_body, out0,
                            unroll=True if n_chunks <= 4 else 2)
        o_ref[0] = out.astype(o_ref.dtype)                 # residual 2


# ---------------------------------------------------------------------------
# Wrapper
# ---------------------------------------------------------------------------
def block_forward(x, params, n_head, *, compute_dtype=jnp.bfloat16,
                  single_buffer_weights=True):
    (w_qkv, b_qkv, w_proj, b_proj, g1, be1, g2, be2,
     w_fc1, b_fc1, w_fc2, b_fc2) = params
    B, T, C = x.shape
    hd = C // n_head
    cdt = jnp.dtype(compute_dtype)
    itm = cdt.itemsize
    approx_recip = bool(cdt != jnp.dtype(jnp.float32))
    sbw = single_buffer_weights
    wbuf = 1 if sbw else 2

    # matmul weights in the MXU compute dtype
    w_qkv_c = w_qkv.astype(cdt)
    w_proj_c = w_proj.astype(cdt)
    w_fc1_c = w_fc1.astype(cdt)
    w_fc2_c = w_fc2.astype(cdt)

    # ---------------- kernel 1: LN1 + fused QKV, head-major outputs ----------------
    tr = _pick_tile(T, 512)
    vmem1 = _vmem_limit(C * 3 * C * itm * wbuf            # fused QKV weight
                        + 2 * tr * C * 4                  # x tiles (double buffered, f32)
                        + 3 * 2 * tr * C * itm)           # q/k/v output tiles
    q, k, v = pl.pallas_call(
        functools.partial(_ln_qkv_kernel, n_head=n_head, compute_dtype=cdt),
        out_shape=[jax.ShapeDtypeStruct((B, n_head, T, hd), cdt)] * 3,
        grid_spec=pltpu.PrefetchScalarGridSpec(
            num_scalar_prefetch=0,
            grid=(B, T // tr),
            in_specs=[
                pl.BlockSpec((1, tr, C), lambda b, i: (b, i, 0)),      # x row tile
                _const_spec((1, C), sbw), _const_spec((1, C), sbw),    # ln1 g / b
                _const_spec((C, 3 * C), sbw),                          # fused QKV W
                _const_spec((1, 3 * C), sbw),                          # fused QKV b
            ],
            out_specs=[pl.BlockSpec((1, n_head, tr, hd),
                                    lambda b, i: (b, 0, i, 0))] * 3,
        ),
        compiler_params=pltpu.CompilerParams(
            dimension_semantics=("parallel", "parallel"),
            vmem_limit_bytes=vmem1),
    )(x, g1, be1, w_qkv_c, b_qkv)

    # ---------------- kernel 2: attention + proj + LN2 + MLP ----------------
    tq = _pick_tile(T, 256)
    tk = tq
    nq, nk = T // tq, T // tk
    mlp_chunk = _pick_chunk(4 * C)

    def kv_index(b, qi, ki):
        # clamp to the causal frontier: same block index => DMA elided for skipped tiles
        last_ki = ((qi + 1) * tq - 1) // tk
        return (b, 0, jnp.minimum(ki, last_ki), 0)

    kernel2 = functools.partial(
        _attn_mlp_kernel, n_head=n_head, tq=tq, tk=tk,
        mlp_chunk=mlp_chunk, compute_dtype=cdt, approx_recip=approx_recip)

    vmem2 = _vmem_limit((C * C + 8 * C * C) * itm * wbuf          # proj + fc1 + fc2 weights
                        + 2 * 2 * tq * C * 4                      # x & out tiles (f32)
                        + 3 * 2 * tq * C * itm                    # q/k/v tiles
                        + tq * C * 4                              # acc scratch
                        + 2 * n_head * tq * 128 * 4)              # lane-padded m/l scratch

    out = pl.pallas_call(
        kernel2,
        out_shape=jax.ShapeDtypeStruct((B, T, C), x.dtype),
        grid_spec=pltpu.PrefetchScalarGridSpec(
            num_scalar_prefetch=0,
            grid=(B, nq, nk),
            in_specs=[
                pl.BlockSpec((1, tq, C), lambda b, qi, ki: (b, qi, 0)),              # x (residual)
                pl.BlockSpec((1, n_head, tq, hd), lambda b, qi, ki: (b, 0, qi, 0)),  # q tile
                pl.BlockSpec((1, n_head, tk, hd), kv_index),                         # k tile
                pl.BlockSpec((1, n_head, tk, hd), kv_index),                         # v tile
                _const_spec((C, C), sbw),                                            # proj W
                _const_spec((1, C), sbw),                                            # proj b
                _const_spec((1, C), sbw), _const_spec((1, C), sbw),                  # ln2 g / b
                _const_spec((C, 4 * C), sbw), _const_spec((1, 4 * C), sbw),          # fc1 W / b
                _const_spec((4 * C, C), sbw), _const_spec((1, C), sbw),              # fc2 W / b
            ],
            out_specs=pl.BlockSpec((1, tq, C), lambda b, qi, ki: (b, qi, 0)),
            scratch_shapes=[
                pltpu.VMEM((n_head, tq, 1), jnp.float32),    # m (running max)
                pltpu.VMEM((n_head, tq, 1), jnp.float32),    # l (running denom)
                pltpu.VMEM((n_head, tq, hd), jnp.float32),   # acc (running numerator)
            ],
        ),
        compiler_params=pltpu.CompilerParams(
            dimension_semantics=("parallel", "parallel", "arbitrary"),
            vmem_limit_bytes=vmem2),
    )(x, q, k, v, w_proj_c, b_proj, g2, be2, w_fc1_c, b_fc1, w_fc2_c, b_fc2)
    return out


# ---------------------------------------------------------------------------
# Pure-JAX reference (same math as the PyTorch module, eval mode)
# ---------------------------------------------------------------------------
def block_reference(x, params, n_head):
    (w_qkv, b_qkv, w_proj, b_proj, g1, be1, g2, be2,
     w_fc1, b_fc1, w_fc2, b_fc2) = params
    B, T, C = x.shape
    hd = C // n_head

    def ln(h, g, b):
        mu = jnp.mean(h, axis=-1, keepdims=True)
        var = jnp.mean((h - mu) ** 2, axis=-1, keepdims=True)
        return (h - mu) / jnp.sqrt(var + _EPS) * g + b

    h = ln(x, g1, be1)
    qkv = h @ w_qkv + b_qkv
    q, k, v = jnp.split(qkv, 3, axis=-1)
    q = q.reshape(B, T, n_head, hd).transpose(0, 2, 1, 3)
    k = k.reshape(B, T, n_head, hd).transpose(0, 2, 1, 3)
    v = v.reshape(B, T, n_head, hd).transpose(0, 2, 1, 3)
    s = jnp.einsum("bhqd,bhkd->bhqk", q, k) / math.sqrt(hd)
    mask = jnp.tril(jnp.ones((T, T), dtype=bool))
    s = jnp.where(mask, s, -jnp.inf)
    p = jax.nn.softmax(s, axis=-1)
    y = jnp.einsum("bhqk,bhkd->bhqd", p, v)
    y = y.transpose(0, 2, 1, 3).reshape(B, T, C)
    x1 = x + (y @ w_proj + b_proj)

    h2 = ln(x1, g2, be2)
    f = jax.nn.gelu(h2 @ w_fc1 + b_fc1, approximate=False)
    return x1 + (f @ w_fc2 + b_fc2)


# ---------------------------------------------------------------------------
if __name__ == "__main__":
    B, T, C, n_head = 2, 8, 32, 4

    key = jax.random.PRNGKey(0)
    keys = jax.random.split(key, 12)

    def init(k, shape, scale=0.02):
        return (scale * jax.random.normal(k, shape)).astype(jnp.float32)

    x = jax.random.normal(keys[0], (B, T, C), dtype=jnp.float32)

    # Linear weights stored pre-transposed as (in, out); biases as (1, out).
    w_qkv = init(keys[1], (C, 3 * C))
    b_qkv = init(keys[2], (1, 3 * C))
    w_proj = init(keys[3], (C, C))
    b_proj = init(keys[4], (1, C))
    g1 = 1.0 + init(keys[5], (1, C))
    be1 = init(keys[6], (1, C))
    g2 = 1.0 + init(keys[7], (1, C))
    be2 = init(keys[8], (1, C))
    w_fc1 = init(keys[9], (C, 4 * C))
    b_fc1 = init(keys[10], (1, 4 * C))
    w_fc2 = init(keys[11], (4 * C, C))
    b_fc2 = jnp.zeros((1, C), jnp.float32)

    params = (w_qkv, b_qkv, w_proj, b_proj, g1, be1, g2, be2,
              w_fc1, b_fc1, w_fc2, b_fc2)

    ref = block_reference(x, params, n_head)

    def run(dt):
        try:
            return block_forward(x, params, n_head, compute_dtype=dt,
                                 single_buffer_weights=True)
        except Exception:
            # Fallback if this jax build rejects pipeline_mode=pl.Buffered(1) on
            # constant-index weight specs; same kernels, default double buffering.
            return block_forward(x, params, n_head, compute_dtype=dt,
                                 single_buffer_weights=False)

    # precise path (f32 operands) -- strict check of the kernel math
    out_f32 = jax.block_until_ready(run(jnp.float32))
    np.testing.assert_allclose(np.asarray(out_f32), np.asarray(ref),
                               rtol=1e-4, atol=1e-4)

    # fast path (bf16 MXU operands, f32 accumulation) -- looser tolerance
    out_bf16 = jax.block_until_ready(run(jnp.bfloat16))
    np.testing.assert_allclose(np.asarray(out_bf16), np.asarray(ref),
                               rtol=3e-2, atol=3e-2)

    print("KERNEL_OK")
</pallas_src>

<mosaic_0001>
module attributes {stable_mosaic.version = 11 : i64} {
  func.func @_ln_qkv_kernel(%arg0: i32, %arg1: i32, %arg2: memref<1x8x32xf32, #tpu.memory_space<vmem>>, %arg3: memref<1x32xf32, #tpu.memory_space<vmem>>, %arg4: memref<1x32xf32, #tpu.memory_space<vmem>>, %arg5: memref<32x96xf32, #tpu.memory_space<vmem>>, %arg6: memref<1x96xf32, #tpu.memory_space<vmem>>, %arg7: memref<1x4x8x8xf32, #tpu.memory_space<vmem>>, %arg8: memref<1x4x8x8xf32, #tpu.memory_space<vmem>>, %arg9: memref<1x4x8x8xf32, #tpu.memory_space<vmem>>) attributes {dimension_semantics = [#tpu.dimension_semantics<parallel>, #tpu.dimension_semantics<parallel>], iteration_bounds = array<i64: 2, 1>, scalar_prefetch = 0 : i64, scratch_operands = 0 : i64, tpu.core_type = #tpu.core_type<tc>, window_params = [{transform_indices = @transform_0, window_bounds = array<i64: 1, 8, 32>}, {pipeline_mode = #tpu.pipeline_mode<synchronous>, transform_indices = @transform_1, window_bounds = array<i64: 1, 32>}, {pipeline_mode = #tpu.pipeline_mode<synchronous>, transform_indices = @transform_2, window_bounds = array<i64: 1, 32>}, {pipeline_mode = #tpu.pipeline_mode<synchronous>, transform_indices = @transform_3, window_bounds = array<i64: 32, 96>}, {pipeline_mode = #tpu.pipeline_mode<synchronous>, transform_indices = @transform_4, window_bounds = array<i64: 1, 96>}, {transform_indices = @transform_5, window_bounds = array<i64: 1, 4, 8, 8>}, {transform_indices = @transform_6, window_bounds = array<i64: 1, 4, 8, 8>}, {transform_indices = @transform_7, window_bounds = array<i64: 1, 4, 8, 8>}]} {
    %c0 = arith.constant 0 : index
    %c0_0 = arith.constant 0 : index
    %c0_1 = arith.constant 0 : index
    %0 = vector.load %arg2[%c0, %c0_0, %c0_1] : memref<1x8x32xf32, #tpu.memory_space<vmem>>, vector<1x8x32xf32>
    %1 = vector.shape_cast %0 : vector<1x8x32xf32> to vector<8x32xf32>
    %cst = arith.constant dense<0.000000e+00> : vector<8xf32>
    %2 = vector.multi_reduction <add>, %1, %cst [1] : vector<8x32xf32> to vector<8xf32>
    %3 = vector.shape_cast %2 : vector<8xf32> to vector<8x1xf32>
    %cst_2 = arith.constant 3.200000e+01 : f32
    %4 = vector.broadcast %cst_2 : f32 to vector<8x1xf32>
    %5 = arith.divf %3, %4 : vector<8x1xf32>
    %6 = vector.broadcast %5 : vector<8x1xf32> to vector<8x32xf32>
    %7 = arith.subf %1, %6 : vector<8x32xf32>
    %8 = arith.mulf %7, %7 : vector<8x32xf32>
    %cst_3 = arith.constant dense<0.000000e+00> : vector<8xf32>
    %9 = vector.multi_reduction <add>, %8, %cst_3 [1] : vector<8x32xf32> to vector<8xf32>
    %10 = vector.shape_cast %9 : vector<8xf32> to vector<8x1xf32>
    %cst_4 = arith.constant 3.200000e+01 : f32
    %11 = vector.broadcast %cst_4 : f32 to vector<8x1xf32>
    %12 = arith.divf %10, %11 : vector<8x1xf32>
    %13 = vector.broadcast %5 : vector<8x1xf32> to vector<8x32xf32>
    %14 = arith.subf %1, %13 : vector<8x32xf32>
    %cst_5 = arith.constant 9.99999974E-6 : f32
    %15 = vector.broadcast %cst_5 : f32 to vector<8x1xf32>
    %16 = arith.addf %12, %15 : vector<8x1xf32>
    %17 = math.rsqrt %16 : vector<8x1xf32>
    %18 = vector.broadcast %17 : vector<8x1xf32> to vector<8x32xf32>
    %19 = arith.mulf %14, %18 : vector<8x32xf32>
    %c0_6 = arith.constant 0 : index
    %c0_7 = arith.constant 0 : index
    %20 = vector.load %arg3[%c0_6, %c0_7] : memref<1x32xf32, #tpu.memory_space<vmem>>, vector<1x32xf32>
    %21 = vector.broadcast %20 : vector<1x32xf32> to vector<8x32xf32>
    %22 = arith.mulf %19, %21 : vector<8x32xf32>
    %c0_8 = arith.constant 0 : index
    %c0_9 = arith.constant 0 : index
    %23 = vector.load %arg4[%c0_8, %c0_9] : memref<1x32xf32, #tpu.memory_space<vmem>>, vector<1x32xf32>
    %24 = vector.broadcast %23 : vector<1x32xf32> to vector<8x32xf32>
    %25 = arith.addf %22, %24 : vector<8x32xf32>
    %c0_10 = arith.constant 0 : index
    %c0_11 = arith.constant 0 : index
    %26 = vector.load %arg5[%c0_10, %c0_11] : memref<32x96xf32, #tpu.memory_space<vmem>>, vector<32x96xf32>
    %cst_12 = arith.constant dense<0.000000e+00> : vector<8x96xf32>
    %27 = tpu.matmul %25, %26, %cst_12 {dimension_numbers = #tpu.dot_dimension_numbers<[1], [0], [0], [1], [0, 0, 1, 1], [], []>} : vector<8x32xf32>, vector<32x96xf32>, vector<8x96xf32> -> vector<8x96xf32>
    %c0_13 = arith.constant 0 : index
    %c0_14 = arith.constant 0 : index
    %28 = vector.load %arg6[%c0_13, %c0_14] : memref<1x96xf32, #tpu.memory_space<vmem>>, vector<1x96xf32>
    %29 = vector.broadcast %28 : vector<1x96xf32> to vector<8x96xf32>
    %30 = arith.addf %27, %29 : vector<8x96xf32>
    %31 = vector.extract_strided_slice %30 {offsets = [0, 0], sizes = [8, 8], strides = [1, 1]} : vector<8x96xf32> to vector<8x8xf32>
    %c0_15 = arith.constant 0 : index
    %c0_16 = arith.constant 0 : index
    %c0_17 = arith.constant 0 : index
    %c0_18 = arith.constant 0 : index
    %32 = vector.load %arg7[%c0_15, %c0_16, %c0_17, %c0_18] : memref<1x4x8x8xf32, #tpu.memory_space<vmem>>, vector<1x1x8x8xf32>
    %33 = vector.shape_cast %32 : vector<1x1x8x8xf32> to vector<8x8xf32>
    %34 = vector.shape_cast %31 : vector<8x8xf32> to vector<1x1x8x8xf32>
    tpu.vector_store %arg7[%c0_15, %c0_16, %c0_17, %c0_18], %34 {strides = array<i32>} : memref<1x4x8x8xf32, #tpu.memory_space<vmem>>, vector<1x1x8x8xf32>,
    %35 = vector.extract_strided_slice %30 {offsets = [0, 32], sizes = [8, 8], strides = [1, 1]} : vector<8x96xf32> to vector<8x8xf32>
    %c0_19 = arith.constant 0 : index
    %c0_20 = arith.constant 0 : index
    %c0_21 = arith.constant 0 : index
    %c0_22 = arith.constant 0 : index
    %36 = vector.load %arg8[%c0_19, %c0_20, %c0_21, %c0_22] : memref<1x4x8x8xf32, #tpu.memory_space<vmem>>, vector<1x1x8x8xf32>
    %37 = vector.shape_cast %36 : vector<1x1x8x8xf32> to vector<8x8xf32>
    %38 = vector.shape_cast %35 : vector<8x8xf32> to vector<1x1x8x8xf32>
    tpu.vector_store %arg8[%c0_19, %c0_20, %c0_21, %c0_22], %38 {strides = array<i32>} : memref<1x4x8x8xf32, #tpu.memory_space<vmem>>, vector<1x1x8x8xf32>,
    %39 = vector.extract_strided_slice %30 {offsets = [0, 64], sizes = [8, 8], strides = [1, 1]} : vector<8x96xf32> to vector<8x8xf32>
    %c0_23 = arith.constant 0 : index
    %c0_24 = arith.constant 0 : index
    %c0_25 = arith.constant 0 : index
    %c0_26 = arith.constant 0 : index
    %40 = vector.load %arg9[%c0_23, %c0_24, %c0_25, %c0_26] : memref<1x4x8x8xf32, #tpu.memory_space<vmem>>, vector<1x1x8x8xf32>
    %41 = vector.shape_cast %40 : vector<1x1x8x8xf32> to vector<8x8xf32>
    %42 = vector.shape_cast %39 : vector<8x8xf32> to vector<1x1x8x8xf32>
    tpu.vector_store %arg9[%c0_23, %c0_24, %c0_25, %c0_26], %42 {strides = array<i32>} : memref<1x4x8x8xf32, #tpu.memory_space<vmem>>, vector<1x1x8x8xf32>,
    %43 = vector.extract_strided_slice %30 {offsets = [0, 8], sizes = [8, 8], strides = [1, 1]} : vector<8x96xf32> to vector<8x8xf32>
    %c0_27 = arith.constant 0 : index
    %c1 = arith.constant 1 : index
    %c0_28 = arith.constant 0 : index
    %c0_29 = arith.constant 0 : index
    %44 = vector.load %arg7[%c0_27, %c1, %c0_28, %c0_29] : memref<1x4x8x8xf32, #tpu.memory_space<vmem>>, vector<1x1x8x8xf32>
    %45 = vector.shape_cast %44 : vector<1x1x8x8xf32> to vector<8x8xf32>
    %46 = vector.shape_cast %43 : vector<8x8xf32> to vector<1x1x8x8xf32>
    tpu.vector_store %arg7[%c0_27, %c1, %c0_28, %c0_29], %46 {strides = array<i32>} : memref<1x4x8x8xf32, #tpu.memory_space<vmem>>, vector<1x1x8x8xf32>,
    %47 = vector.extract_strided_slice %30 {offsets = [0, 40], sizes = [8, 8], strides = [1, 1]} : vector<8x96xf32> to vector<8x8xf32>
    %c0_30 = arith.constant 0 : index
    %c1_31 = arith.constant 1 : index
    %c0_32 = arith.constant 0 : index
    %c0_33 = arith.constant 0 : index
    %48 = vector.load %arg8[%c0_30, %c1_31, %c0_32, %c0_33] : memref<1x4x8x8xf32, #tpu.memory_space<vmem>>, vector<1x1x8x8xf32>
    %49 = vector.shape_cast %48 : vector<1x1x8x8xf32> to vector<8x8xf32>
    %50 = vector.shape_cast %47 : vector<8x8xf32> to vector<1x1x8x8xf32>
    tpu.vector_store %arg8[%c0_30, %c1_31, %c0_32, %c0_33], %50 {strides = array<i32>} : memref<1x4x8x8xf32, #tpu.memory_space<vmem>>, vector<1x1x8x8xf32>,
    %51 = vector.extract_strided_slice %30 {offsets = [0, 72], sizes = [8, 8], strides = [1, 1]} : vector<8x96xf32> to vector<8x8xf32>
    %c0_34 = arith.constant 0 : index
    %c1_35 = arith.constant 1 : index
    %c0_36 = arith.constant 0 : index
    %c0_37 = arith.constant 0 : index
    %52 = vector.load %arg9[%c0_34, %c1_35, %c0_36, %c0_37] : memref<1x4x8x8xf32, #tpu.memory_space<vmem>>, vector<1x1x8x8xf32>
    %53 = vector.shape_cast %52 : vector<1x1x8x8xf32> to vector<8x8xf32>
    %54 = vector.shape_cast %51 : vector<8x8xf32> to vector<1x1x8x8xf32>
    tpu.vector_store %arg9[%c0_34, %c1_35, %c0_36, %c0_37], %54 {strides = array<i32>} : memref<1x4x8x8xf32, #tpu.memory_space<vmem>>, vector<1x1x8x8xf32>,
    %55 = vector.extract_strided_slice %30 {offsets = [0, 16], sizes = [8, 8], strides = [1, 1]} : vector<8x96xf32> to vector<8x8xf32>
    %c0_38 = arith.constant 0 : index
    %c2 = arith.constant 2 : index
    %c0_39 = arith.constant 0 : index
    %c0_40 = arith.constant 0 : index
    %56 = vector.load %arg7[%c0_38, %c2, %c0_39, %c0_40] : memref<1x4x8x8xf32, #tpu.memory_space<vmem>>, vector<1x1x8x8xf32>
    %57 = vector.shape_cast %56 : vector<1x1x8x8xf32> to vector<8x8xf32>
    %58 = vector.shape_cast %55 : vector<8x8xf32> to vector<1x1x8x8xf32>
    tpu.vector_store %arg7[%c0_38, %c2, %c0_39, %c0_40], %58 {strides = array<i32>} : memref<1x4x8x8xf32, #tpu.memory_space<vmem>>, vector<1x1x8x8xf32>,
    %59 = vector.extract_strided_slice %30 {offsets = [0, 48], sizes = [8, 8], strides = [1, 1]} : vector<8x96xf32> to vector<8x8xf32>
    %c0_41 = arith.constant 0 : index
    %c2_42 = arith.constant 2 : index
    %c0_43 = arith.constant 0 : index
    %c0_44 = arith.constant 0 : index
    %60 = vector.load %arg8[%c0_41, %c2_42, %c0_43, %c0_44] : memref<1x4x8x8xf32, #tpu.memory_space<vmem>>, vector<1x1x8x8xf32>
    %61 = vector.shape_cast %60 : vector<1x1x8x8xf32> to vector<8x8xf32>
    %62 = vector.shape_cast %59 : vector<8x8xf32> to vector<1x1x8x8xf32>
    tpu.vector_store %arg8[%c0_41, %c2_42, %c0_43, %c0_44], %62 {strides = array<i32>} : memref<1x4x8x8xf32, #tpu.memory_space<vmem>>, vector<1x1x8x8xf32>,
    %63 = vector.extract_strided_slice %30 {offsets = [0, 80], sizes = [8, 8], strides = [1, 1]} : vector<8x96xf32> to vector<8x8xf32>
    %c0_45 = arith.constant 0 : index
    %c2_46 = arith.constant 2 : index
    %c0_47 = arith.constant 0 : index
    %c0_48 = arith.constant 0 : index
    %64 = vector.load %arg9[%c0_45, %c2_46, %c0_47, %c0_48] : memref<1x4x8x8xf32, #tpu.memory_space<vmem>>, vector<1x1x8x8xf32>
    %65 = vector.shape_cast %64 : vector<1x1x8x8xf32> to vector<8x8xf32>
    %66 = vector.shape_cast %63 : vector<8x8xf32> to vector<1x1x8x8xf32>
    tpu.vector_store %arg9[%c0_45, %c2_46, %c0_47, %c0_48], %66 {strides = array<i32>} : memref<1x4x8x8xf32, #tpu.memory_space<vmem>>, vector<1x1x8x8xf32>,
    %67 = vector.extract_strided_slice %30 {offsets = [0, 24], sizes = [8, 8], strides = [1, 1]} : vector<8x96xf32> to vector<8x8xf32>
    %c0_49 = arith.constant 0 : index
    %c3 = arith.constant 3 : index
    %c0_50 = arith.constant 0 : index
    %c0_51 = arith.constant 0 : index
    %68 = vector.load %arg7[%c0_49, %c3, %c0_50, %c0_51] : memref<1x4x8x8xf32, #tpu.memory_space<vmem>>, vector<1x1x8x8xf32>
    %69 = vector.shape_cast %68 : vector<1x1x8x8xf32> to vector<8x8xf32>
    %70 = vector.shape_cast %67 : vector<8x8xf32> to vector<1x1x8x8xf32>
    tpu.vector_store %arg7[%c0_49, %c3, %c0_50, %c0_51], %70 {strides = array<i32>} : memref<1x4x8x8xf32, #tpu.memory_space<vmem>>, vector<1x1x8x8xf32>,
    %71 = vector.extract_strided_slice %30 {offsets = [0, 56], sizes = [8, 8], strides = [1, 1]} : vector<8x96xf32> to vector<8x8xf32>
    %c0_52 = arith.constant 0 : index
    %c3_53 = arith.constant 3 : index
    %c0_54 = arith.constant 0 : index
    %c0_55 = arith.constant 0 : index
    %72 = vector.load %arg8[%c0_52, %c3_53, %c0_54, %c0_55] : memref<1x4x8x8xf32, #tpu.memory_space<vmem>>, vector<1x1x8x8xf32>
    %73 = vector.shape_cast %72 : vector<1x1x8x8xf32> to vector<8x8xf32>
    %74 = vector.shape_cast %71 : vector<8x8xf32> to vector<1x1x8x8xf32>
    tpu.vector_store %arg8[%c0_52, %c3_53, %c0_54, %c0_55], %74 {strides = array<i32>} : memref<1x4x8x8xf32, #tpu.memory_space<vmem>>, vector<1x1x8x8xf32>,
    %75 = vector.extract_strided_slice %30 {offsets = [0, 88], sizes = [8, 8], strides = [1, 1]} : vector<8x96xf32> to vector<8x8xf32>
    %c0_56 = arith.constant 0 : index
    %c3_57 = arith.constant 3 : index
    %c0_58 = arith.constant 0 : index
    %c0_59 = arith.constant 0 : index
    %76 = vector.load %arg9[%c0_56, %c3_57, %c0_58, %c0_59] : memref<1x4x8x8xf32, #tpu.memory_space<vmem>>, vector<1x1x8x8xf32>
    %77 = vector.shape_cast %76 : vector<1x1x8x8xf32> to vector<8x8xf32>
    %78 = vector.shape_cast %75 : vector<8x8xf32> to vector<1x1x8x8xf32>
    tpu.vector_store %arg9[%c0_56, %c3_57, %c0_58, %c0_59], %78 {strides = array<i32>} : memref<1x4x8x8xf32, #tpu.memory_space<vmem>>, vector<1x1x8x8xf32>,
    return
  }
  func.func @transform_0(%arg0: i32, %arg1: i32) -> (i32, i32, i32) {
    %c0_i32 = arith.constant 0 : i32
    %c0_i32_0 = arith.constant 0 : i32
    return %arg0, %arg1, %c0_i32 : i32, i32, i32
  }
  func.func @transform_1(%arg0: i32, %arg1: i32) -> (i32, i32) {
    %c0_i32 = arith.constant 0 : i32
    %c0_i32_0 = arith.constant 0 : i32
    %c0_i32_1 = arith.constant 0 : i32
    return %c0_i32, %c0_i32_0 : i32, i32
  }
  func.func @transform_2(%arg0: i32, %arg1: i32) -> (i32, i32) {
    %c0_i32 = arith.constant 0 : i32
    %c0_i32_0 = arith.constant 0 : i32
    %c0_i32_1 = arith.constant 0 : i32
    return %c0_i32, %c0_i32_0 : i32, i32
  }
  func.func @transform_3(%arg0: i32, %arg1: i32) -> (i32, i32) {
    %c0_i32 = arith.constant 0 : i32
    %c0_i32_0 = arith.constant 0 : i32
    %c0_i32_1 = arith.constant 0 : i32
    return %c0_i32, %c0_i32_0 : i32, i32
  }
  func.func @transform_4(%arg0: i32, %arg1: i32) -> (i32, i32) {
    %c0_i32 = arith.constant 0 : i32
    %c0_i32_0 = arith.constant 0 : i32
    %c0_i32_1 = arith.constant 0 : i32
    return %c0_i32, %c0_i32_0 : i32, i32
  }
  func.func @transform_5(%arg0: i32, %arg1: i32) -> (i32, i32, i32, i32) {
    %c0_i32 = arith.constant 0 : i32
    %c0_i32_0 = arith.constant 0 : i32
    %c0_i32_1 = arith.constant 0 : i32
    return %arg0, %c0_i32, %arg1, %c0_i32_0 : i32, i32, i32, i32
  }
  func.func @transform_6(%arg0: i32, %arg1: i32) -> (i32, i32, i32, i32) {
    %c0_i32 = arith.constant 0 : i32
    %c0_i32_0 = arith.constant 0 : i32
    %c0_i32_1 = arith.constant 0 : i32
    return %arg0, %c0_i32, %arg1, %c0_i32_0 : i32, i32, i32, i32
  }
  func.func @transform_7(%arg0: i32, %arg1: i32) -> (i32, i32, i32, i32) {
    %c0_i32 = arith.constant 0 : i32
    %c0_i32_0 = arith.constant 0 : i32
    %c0_i32_1 = arith.constant 0 : i32
    return %arg0, %c0_i32, %arg1, %c0_i32_0 : i32, i32, i32, i32
  }
}

module attributes {stable_mosaic.version = 11 : i64} {
  func.func @_ln_qkv_kernel(%arg0: i32, %arg1: i32, %arg2: memref<1x8x32xf32, #tpu.memory_space<vmem>>, %arg3: memref<1x32xf32, #tpu.memory_space<vmem>>, %arg4: memref<1x32xf32, #tpu.memory_space<vmem>>, %arg5: memref<32x96xf32, #tpu.memory_space<vmem>>, %arg6: memref<1x96xf32, #tpu.memory_space<vmem>>, %arg7: memref<1x4x8x8xf32, #tpu.memory_space<vmem>>, %arg8: memref<1x4x8x8xf32, #tpu.memory_space<vmem>>, %arg9: memref<1x4x8x8xf32, #tpu.memory_space<vmem>>) attributes {dimension_semantics = [#tpu.dimension_semantics<parallel>, #tpu.dimension_semantics<parallel>], iteration_bounds = array<i64: 2, 1>, scalar_prefetch = 0 : i64, scratch_operands = 0 : i64, tpu.core_type = #tpu.core_type<tc>, window_params = [{transform_indices = @transform_0, window_bounds = array<i64: 1, 8, 32>}, {pipeline_mode = #tpu.pipeline_mode<synchronous>, transform_indices = @transform_1, window_bounds = array<i64: 1, 32>}, {pipeline_mode = #tpu.pipeline_mode<synchronous>, transform_indices = @transform_2, window_bounds = array<i64: 1, 32>}, {pipeline_mode = #tpu.pipeline_mode<synchronous>, transform_indices = @transform_3, window_bounds = array<i64: 32, 96>}, {pipeline_mode = #tpu.pipeline_mode<synchronous>, transform_indices = @transform_4, window_bounds = array<i64: 1, 96>}, {transform_indices = @transform_5, window_bounds = array<i64: 1, 4, 8, 8>}, {transform_indices = @transform_6, window_bounds = array<i64: 1, 4, 8, 8>}, {transform_indices = @transform_7, window_bounds = array<i64: 1, 4, 8, 8>}]} {
    %c0 = arith.constant 0 : index
    %c0_0 = arith.constant 0 : index
    %c0_1 = arith.constant 0 : index
    %0 = vector.load %arg2[%c0, %c0_0, %c0_1] : memref<1x8x32xf32, #tpu.memory_space<vmem>>, vector<1x8x32xf32>
    %1 = vector.shape_cast %0 : vector<1x8x32xf32> to vector<8x32xf32>
    %cst = arith.constant dense<0.000000e+00> : vector<8xf32>
    %2 = vector.multi_reduction <add>, %1, %cst [1] : vector<8x32xf32> to vector<8xf32>
    %3 = vector.shape_cast %2 : vector<8xf32> to vector<8x1xf32>
    %cst_2 = arith.constant 3.200000e+01 : f32
    %4 = vector.broadcast %cst_2 : f32 to vector<8x1xf32>
    %5 = arith.divf %3, %4 : vector<8x1xf32>
    %6 = vector.broadcast %5 : vector<8x1xf32> to vector<8x32xf32>
    %7 = arith.subf %1, %6 : vector<8x32xf32>
    %8 = arith.mulf %7, %7 : vector<8x32xf32>
    %cst_3 = arith.constant dense<0.000000e+00> : vector<8xf32>
    %9 = vector.multi_reduction <add>, %8, %cst_3 [1] : vector<8x32xf32> to vector<8xf32>
    %10 = vector.shape_cast %9 : vector<8xf32> to vector<8x1xf32>
    %cst_4 = arith.constant 3.200000e+01 : f32
    %11 = vector.broadcast %cst_4 : f32 to vector<8x1xf32>
    %12 = arith.divf %10, %11 : vector<8x1xf32>
    %13 = vector.broadcast %5 : vector<8x1xf32> to vector<8x32xf32>
    %14 = arith.subf %1, %13 : vector<8x32xf32>
    %cst_5 = arith.constant 9.99999974E-6 : f32
    %15 = vector.broadcast %cst_5 : f32 to vector<8x1xf32>
    %16 = arith.addf %12, %15 : vector<8x1xf32>
    %17 = math.rsqrt %16 : vector<8x1xf32>
    %18 = vector.broadcast %17 : vector<8x1xf32> to vector<8x32xf32>
    %19 = arith.mulf %14, %18 : vector<8x32xf32>
    %c0_6 = arith.constant 0 : index
    %c0_7 = arith.constant 0 : index
    %20 = vector.load %arg3[%c0_6, %c0_7] : memref<1x32xf32, #tpu.memory_space<vmem>>, vector<1x32xf32>
    %21 = vector.broadcast %20 : vector<1x32xf32> to vector<8x32xf32>
    %22 = arith.mulf %19, %21 : vector<8x32xf32>
    %c0_8 = arith.constant 0 : index
    %c0_9 = arith.constant 0 : index
    %23 = vector.load %arg4[%c0_8, %c0_9] : memref<1x32xf32, #tpu.memory_space<vmem>>, vector<1x32xf32>
    %24 = vector.broadcast %23 : vector<1x32xf32> to vector<8x32xf32>
    %25 = arith.addf %22, %24 : vector<8x32xf32>
    %c0_10 = arith.constant 0 : index
    %c0_11 = arith.constant 0 : index
    %26 = vector.load %arg5[%c0_10, %c0_11] : memref<32x96xf32, #tpu.memory_space<vmem>>, vector<32x96xf32>
    %cst_12 = arith.constant dense<0.000000e+00> : vector<8x96xf32>
    %27 = tpu.matmul %25, %26, %cst_12 {dimension_numbers = #tpu.dot_dimension_numbers<[1], [0], [0], [1], [0, 0, 1, 1], [], []>} : vector<8x32xf32>, vector<32x96xf32>, vector<8x96xf32> -> vector<8x96xf32>
    %c0_13 = arith.constant 0 : index
    %c0_14 = arith.constant 0 : index
    %28 = vector.load %arg6[%c0_13, %c0_14] : memref<1x96xf32, #tpu.memory_space<vmem>>, vector<1x96xf32>
    %29 = vector.broadcast %28 : vector<1x96xf32> to vector<8x96xf32>
    %30 = arith.addf %27, %29 : vector<8x96xf32>
    %31 = vector.extract_strided_slice %30 {offsets = [0, 0], sizes = [8, 8], strides = [1, 1]} : vector<8x96xf32> to vector<8x8xf32>
    %c0_15 = arith.constant 0 : index
    %c0_16 = arith.constant 0 : index
    %c0_17 = arith.constant 0 : index
    %c0_18 = arith.constant 0 : index
    %32 = vector.load %arg7[%c0_15, %c0_16, %c0_17, %c0_18] : memref<1x4x8x8xf32, #tpu.memory_space<vmem>>, vector<1x1x8x8xf32>
    %33 = vector.shape_cast %32 : vector<1x1x8x8xf32> to vector<8x8xf32>
    %34 = vector.shape_cast %31 : vector<8x8xf32> to vector<1x1x8x8xf32>
    tpu.vector_store %arg7[%c0_15, %c0_16, %c0_17, %c0_18], %34 {strides = array<i32>} : memref<1x4x8x8xf32, #tpu.memory_space<vmem>>, vector<1x1x8x8xf32>,
    %35 = vector.extract_strided_slice %30 {offsets = [0, 32], sizes = [8, 8], strides = [1, 1]} : vector<8x96xf32> to vector<8x8xf32>
    %c0_19 = arith.constant 0 : index
    %c0_20 = arith.constant 0 : index
    %c0_21 = arith.constant 0 : index
    %c0_22 = arith.constant 0 : index
    %36 = vector.load %arg8[%c0_19, %c0_20, %c0_21, %c0_22] : memref<1x4x8x8xf32, #tpu.memory_space<vmem>>, vector<1x1x8x8xf32>
    %37 = vector.shape_cast %36 : vector<1x1x8x8xf32> to vector<8x8xf32>
    %38 = vector.shape_cast %35 : vector<8x8xf32> to vector<1x1x8x8xf32>
    tpu.vector_store %arg8[%c0_19, %c0_20, %c0_21, %c0_22], %38 {strides = array<i32>} : memref<1x4x8x8xf32, #tpu.memory_space<vmem>>, vector<1x1x8x8xf32>,
    %39 = vector.extract_strided_slice %30 {offsets = [0, 64], sizes = [8, 8], strides = [1, 1]} : vector<8x96xf32> to vector<8x8xf32>
    %c0_23 = arith.constant 0 : index
    %c0_24 = arith.constant 0 : index
    %c0_25 = arith.constant 0 : index
    %c0_26 = arith.constant 0 : index
    %40 = vector.load %arg9[%c0_23, %c0_24, %c0_25, %c0_26] : memref<1x4x8x8xf32, #tpu.memory_space<vmem>>, vector<1x1x8x8xf32>
    %41 = vector.shape_cast %40 : vector<1x1x8x8xf32> to vector<8x8xf32>
    %42 = vector.shape_cast %39 : vector<8x8xf32> to vector<1x1x8x8xf32>
    tpu.vector_store %arg9[%c0_23, %c0_24, %c0_25, %c0_26], %42 {strides = array<i32>} : memref<1x4x8x8xf32, #tpu.memory_space<vmem>>, vector<1x1x8x8xf32>,
    %43 = vector.extract_strided_slice %30 {offsets = [0, 8], sizes = [8, 8], strides = [1, 1]} : vector<8x96xf32> to vector<8x8xf32>
    %c0_27 = arith.constant 0 : index
    %c1 = arith.constant 1 : index
    %c0_28 = arith.constant 0 : index
    %c0_29 = arith.constant 0 : index
    %44 = vector.load %arg7[%c0_27, %c1, %c0_28, %c0_29] : memref<1x4x8x8xf32, #tpu.memory_space<vmem>>, vector<1x1x8x8xf32>
    %45 = vector.shape_cast %44 : vector<1x1x8x8xf32> to vector<8x8xf32>
    %46 = vector.shape_cast %43 : vector<8x8xf32> to vector<1x1x8x8xf32>
    tpu.vector_store %arg7[%c0_27, %c1, %c0_28, %c0_29], %46 {strides = array<i32>} : memref<1x4x8x8xf32, #tpu.memory_space<vmem>>, vector<1x1x8x8xf32>,
    %47 = vector.extract_strided_slice %30 {offsets = [0, 40], sizes = [8, 8], strides = [1, 1]} : vector<8x96xf32> to vector<8x8xf32>
    %c0_30 = arith.constant 0 : index
    %c1_31 = arith.constant 1 : index
    %c0_32 = arith.constant 0 : index
    %c0_33 = arith.constant 0 : index
    %48 = vector.load %arg8[%c0_30, %c1_31, %c0_32, %c0_33] : memref<1x4x8x8xf32, #tpu.memory_space<vmem>>, vector<1x1x8x8xf32>
    %49 = vector.shape_cast %48 : vector<1x1x8x8xf32> to vector<8x8xf32>
    %50 = vector.shape_cast %47 : vector<8x8xf32> to vector<1x1x8x8xf32>
    tpu.vector_store %arg8[%c0_30, %c1_31, %c0_32, %c0_33], %50 {strides = array<i32>} : memref<1x4x8x8xf32, #tpu.memory_space<vmem>>, vector<1x1x8x8xf32>,
    %51 = vector.extract_strided_slice %30 {offsets = [0, 72], sizes = [8, 8], strides = [1, 1]} : vector<8x96xf32> to vector<8x8xf32>
    %c0_34 = arith.constant 0 : index
    %c1_35 = arith.constant 1 : index
    %c0_36 = arith.constant 0 : index
    %c0_37 = arith.constant 0 : index
    %52 = vector.load %arg9[%c0_34, %c1_35, %c0_36, %c0_37] : memref<1x4x8x8xf32, #tpu.memory_space<vmem>>, vector<1x1x8x8xf32>
    %53 = vector.shape_cast %52 : vector<1x1x8x8xf32> to vector<8x8xf32>
    %54 = vector.shape_cast %51 : vector<8x8xf32> to vector<1x1x8x8xf32>
    tpu.vector_store %arg9[%c0_34, %c1_35, %c0_36, %c0_37], %54 {strides = array<i32>} : memref<1x4x8x8xf32, #tpu.memory_space<vmem>>, vector<1x1x8x8xf32>,
    %55 = vector.extract_strided_slice %30 {offsets = [0, 16], sizes = [8, 8], strides = [1, 1]} : vector<8x96xf32> to vector<8x8xf32>
    %c0_38 = arith.constant 0 : index
    %c2 = arith.constant 2 : index
    %c0_39 = arith.constant 0 : index
    %c0_40 = arith.constant 0 : index
    %56 = vector.load %arg7[%c0_38, %c2, %c0_39, %c0_40] : memref<1x4x8x8xf32, #tpu.memory_space<vmem>>, vector<1x1x8x8xf32>
    %57 = vector.shape_cast %56 : vector<1x1x8x8xf32> to vector<8x8xf32>
    %58 = vector.shape_cast %55 : vector<8x8xf32> to vector<1x1x8x8xf32>
    tpu.vector_store %arg7[%c0_38, %c2, %c0_39, %c0_40], %58 {strides = array<i32>} : memref<1x4x8x8xf32, #tpu.memory_space<vmem>>, vector<1x1x8x8xf32>,
    %59 = vector.extract_strided_slice %30 {offsets = [0, 48], sizes = [8, 8], strides = [1, 1]} : vector<8x96xf32> to vector<8x8xf32>
    %c0_41 = arith.constant 0 : index
    %c2_42 = arith.constant 2 : index
    %c0_43 = arith.constant 0 : index
    %c0_44 = arith.constant 0 : index
    %60 = vector.load %arg8[%c0_41, %c2_42, %c0_43, %c0_44] : memref<1x4x8x8xf32, #tpu.memory_space<vmem>>, vector<1x1x8x8xf32>
    %61 = vector.shape_cast %60 : vector<1x1x8x8xf32> to vector<8x8xf32>
    %62 = vector.shape_cast %59 : vector<8x8xf32> to vector<1x1x8x8xf32>
    tpu.vector_store %arg8[%c0_41, %c2_42, %c0_43, %c0_44], %62 {strides = array<i32>} : memref<1x4x8x8xf32, #tpu.memory_space<vmem>>, vector<1x1x8x8xf32>,
    %63 = vector.extract_strided_slice %30 {offsets = [0, 80], sizes = [8, 8], strides = [1, 1]} : vector<8x96xf32> to vector<8x8xf32>
    %c0_45 = arith.constant 0 : index
    %c2_46 = arith.constant 2 : index
    %c0_47 = arith.constant 0 : index
    %c0_48 = arith.constant 0 : index
    %64 = vector.load %arg9[%c0_45, %c2_46, %c0_47, %c0_48] : memref<1x4x8x8xf32, #tpu.memory_space<vmem>>, vector<1x1x8x8xf32>
    %65 = vector.shape_cast %64 : vector<1x1x8x8xf32> to vector<8x8xf32>
    %66 = vector.shape_cast %63 : vector<8x8xf32> to vector<1x1x8x8xf32>
    tpu.vector_store %arg9[%c0_45, %c2_46, %c0_47, %c0_48], %66 {strides = array<i32>} : memref<1x4x8x8xf32, #tpu.memory_space<vmem>>, vector<1x1x8x8xf32>,
    %67 = vector.extract_strided_slice %30 {offsets = [0, 24], sizes = [8, 8], strides = [1, 1]} : vector<8x96xf32> to vector<8x8xf32>
    %c0_49 = arith.constant 0 : index
    %c3 = arith.constant 3 : index
    %c0_50 = arith.constant 0 : index
    %c0_51 = arith.constant 0 : index
    %68 = vector.load %arg7[%c0_49, %c3, %c0_50, %c0_51] : memref<1x4x8x8xf32, #tpu.memory_space<vmem>>, vector<1x1x8x8xf32>
    %69 = vector.shape_cast %68 : vector<1x1x8x8xf32> to vector<8x8xf32>
    %70 = vector.shape_cast %67 : vector<8x8xf32> to vector<1x1x8x8xf32>
    tpu.vector_store %arg7[%c0_49, %c3, %c0_50, %c0_51], %70 {strides = array<i32>} : memref<1x4x8x8xf32, #tpu.memory_space<vmem>>, vector<1x1x8x8xf32>,
    %71 = vector.extract_strided_slice %30 {offsets = [0, 56], sizes = [8, 8], strides = [1, 1]} : vector<8x96xf32> to vector<8x8xf32>
    %c0_52 = arith.constant 0 : index
    %c3_53 = arith.constant 3 : index
    %c0_54 = arith.constant 0 : index
    %c0_55 = arith.constant 0 : index
    %72 = vector.load %arg8[%c0_52, %c3_53, %c0_54, %c0_55] : memref<1x4x8x8xf32, #tpu.memory_space<vmem>>, vector<1x1x8x8xf32>
    %73 = vector.shape_cast %72 : vector<1x1x8x8xf32> to vector<8x8xf32>
    %74 = vector.shape_cast %71 : vector<8x8xf32> to vector<1x1x8x8xf32>
    tpu.vector_store %arg8[%c0_52, %c3_53, %c0_54, %c0_55], %74 {strides = array<i32>} : memref<1x4x8x8xf32, #tpu.memory_space<vmem>>, vector<1x1x8x8xf32>,
    %75 = vector.extract_strided_slice %30 {offsets = [0, 88], sizes = [8, 8], strides = [1, 1]} : vector<8x96xf32> to vector<8x8xf32>
    %c0_56 = arith.constant 0 : index
    %c3_57 = arith.constant 3 : index
    %c0_58 = arith.constant 0 : index
    %c0_59 = arith.constant 0 : index
    %76 = vector.load %arg9[%c0_56, %c3_57, %c0_58, %c0_59] : memref<1x4x8x8xf32, #tpu.memory_space<vmem>>, vector<1x1x8x8xf32>
    %77 = vector.shape_cast %76 : vector<1x1x8x8xf32> to vector<8x8xf32>
    %78 = vector.shape_cast %75 : vector<8x8xf32> to vector<1x1x8x8xf32>
    tpu.vector_store %arg9[%c0_56, %c3_57, %c0_58, %c0_59], %78 {strides = array<i32>} : memref<1x4x8x8xf32, #tpu.memory_space<vmem>>, vector<1x1x8x8xf32>,
    return
  }
  func.func @transform_0(%arg0: i32, %arg1: i32) -> (i32, i32, i32) {
    %c0_i32 = arith.constant 0 : i32
    %c0_i32_0 = arith.constant 0 : i32
    return %arg0, %arg1, %c0_i32 : i32, i32, i32
  }
  func.func @transform_1(%arg0: i32, %arg1: i32) -> (i32, i32) {
    %c0_i32 = arith.constant 0 : i32
    %c0_i32_0 = arith.constant 0 : i32
    %c0_i32_1 = arith.constant 0 : i32
    return %c0_i32, %c0_i32_0 : i32, i32
  }
  func.func @transform_2(%arg0: i32, %arg1: i32) -> (i32, i32) {
    %c0_i32 = arith.constant 0 : i32
    %c0_i32_0 = arith.constant 0 : i32
    %c0_i32_1 = arith.constant 0 : i32
    return %c0_i32, %c0_i32_0 : i32, i32
  }
  func.func @transform_3(%arg0: i32, %arg1: i32) -> (i32, i32) {
    %c0_i32 = arith.constant 0 : i32
    %c0_i32_0 = arith.constant 0 : i32
    %c0_i32_1 = arith.constant 0 : i32
    return %c0_i32, %c0_i32_0 : i32, i32
  }
  func.func @transform_4(%arg0: i32, %arg1: i32) -> (i32, i32) {
    %c0_i32 = arith.constant 0 : i32
    %c0_i32_0 = arith.constant 0 : i32
    %c0_i32_1 = arith.constant 0 : i32
    return %c0_i32, %c0_i32_0 : i32, i32
  }
  func.func @transform_5(%arg0: i32, %arg1: i32) -> (i32, i32, i32, i32) {
    %c0_i32 = arith.constant 0 : i32
    %c0_i32_0 = arith.constant 0 : i32
    %c0_i32_1 = arith.constant 0 : i32
    return %arg0, %c0_i32, %arg1, %c0_i32_0 : i32, i32, i32, i32
  }
  func.func @transform_6(%arg0: i32, %arg1: i32) -> (i32, i32, i32, i32) {
    %c0_i32 = arith.constant 0 : i32
    %c0_i32_0 = arith.constant 0 : i32
    %c0_i32_1 = arith.constant 0 : i32
    return %arg0, %c0_i32, %arg1, %c0_i32_0 : i32, i32, i32, i32
  }
  func.func @transform_7(%arg0: i32, %arg1: i32) -> (i32, i32, i32, i32) {
    %c0_i32 = arith.constant 0 : i32
    %c0_i32_0 = arith.constant 0 : i32
    %c0_i32_1 = arith.constant 0 : i32
    return %arg0, %c0_i32, %arg1, %c0_i32_0 : i32, i32, i32, i32
  }
}

</mosaic_0001>

<bundles_post_ra>
// kernel: tpu_custom_call.1
= control target key start
LH: loop header
LB: loop body
LE: loop exit
PB: predicated region body
PF: predicated region fallthrough
CT: control target
= control target key end

     0   :  { %s1450_s0 = inlined_call_operand.hbm [shape: f32[2,8,32], index: 0, kind: input, shape index: {}]   ;;  %s1451_s1 = inlined_call_operand.vmem [shape: f32[1,32], index: 1, kind: input, shape index: {}]   ;;  %s1452_s2 = inlined_call_operand.vmem [shape: f32[1,32], index: 2, kind: input, shape index: {}]   ;;  %s1453_s3 = inlined_call_operand.hbm [shape: f32[32,96], index: 3, kind: input, shape index: {}]   ;;  %s1454_s4 = inlined_call_operand.vmem [shape: f32[1,96], index: 4, kind: input, shape index: {}]   ;;  %s1455_s5 = inlined_call_operand.hbm [shape: f32[2,4,8,8], index: 5, kind: output, shape index: {0}]   ;;  %s1456_s6 = inlined_call_operand.hbm [shape: f32[2,4,8,8], index: 6, kind: output, shape index: {1}]   ;;  %s1457_s7 = inlined_call_operand.hbm [shape: f32[2,4,8,8], index: 7, kind: output, shape index: {2}]  }
   0x1   :  { %1463 = sst [smem:[#allocation18_spill]] %s1453_s3 }
   0x2   :  { %13 = vsyncpa [#allocation3], 0 }
   0x3   :  { %15 = vsyncpa [#allocation3 + $0x1], 0 }
   0x4   :  { %16 = vsyncpa [#allocation6], 0 }
   0x5   :  { %17 = vsyncpa [#allocation4], 0 }
   0x6   :  { %19 = vsyncpa [#allocation4 + $0x1], 0 }
   0x7   :  { %20 = vsyncpa [#allocation9], 0 }
   0x8   :  { %22 = vsyncpa [#allocation9 + $0x1], 0  ;;  %s1154_s24 = smov 0   ;;  %s1156_s25 = smov 0  }
   0x9   :  { %s1158_s26 = smov 0   ;;  %s1160_s27 = smov 0  }
   0xa   :  { %s1162_s28 = smov 0   ;;  %s1164_s29 = smov 0  }
   0xb LB: > { %1464 = sst [smem:[#allocation15_spill]] %s1086_s28  ;;  %s1185_s30 = sadd.s32 4294967295, %s1090_s29   ;;  %s1090_s29 = sphi %s1164_s29, %s28_s29   ;;  %s1086_s28 = sphi %s1162_s28, %s1483_s28   ;;  %s1082_s27 = sphi %s1160_s27, %s1482_s27   ;;  %s1078_s26 = sphi %s1158_s26, %s1486_s26   ;;  %s1074_s25 = sphi %s1156_s25, %s1485_s25   ;;  %s1070_s24 = sphi %s1154_s24, %s1484_s24  }
   0xc   : > { %s1458_s8 = sadd.s32 4294967294, %s1090_s29   ;;  %p62_p0 = scmp.ne.s32.totalorder %s1074_s25, %s1070_s24 }
   0xd   : > { %p1462_p1 = scmp.eq.s32.totalorder %s1185_s30, 0  ;;  %p178_p3 = scmp.eq.s32.totalorder %s1458_s8, 1 }
   0xe   : > { %p740_p5 = scmp.ge.s32.totalorder %s1090_s29, 1  ;;  %p241_p7 = scmp.lt.s32.totalorder %s1090_s29, 3 }
   0xf   : > { %p1196_p4 = por %p1462_p1, %p62_p0  ;;  %p1201_p6 = por %p178_p3, %p62_p0 }
  0x10   : > { %p1206_p8 = pnand %p740_p5, %p241_p7  ;;  %s1092_s12 = smov [#allocation5]  }
  0x11   : > { %s1466_s10 = scalar_select %p1201_p6, 1, 0 }
  0x12   : > { %s259_s13 = sshll.u32 %s1092_s12, 4  ;;  %p806_p9 = pneg %p1206_p8  ;;  %s260_s13 = int_to_ptr.vmem [resolvable:$true] %s259_s13 }
  0x13   : > { %1467 = sst [smem:[#allocation16_spill]] %s1466_s10  ;;  %s40_s15 = sadd.s32 1, %s1086_s28 }
  0x14   : > { %p1215_p11 = pnand %p806_p9, %p1462_p1  ;;  %s907_s16 = scalar_lea.vmem %s260_s13, 512 }
  0x15   : > { %p908_p13 = scmp.ne.s32.totalorder %s260_s13, %s907_s16  ;;  %p915_p5 = scmp.lt.s32.totalorder %s260_s13, %s260_s13 }
  0x16   : > { %p898_p12 = pneg %p1215_p11  ;;  %p916_p7 = scmp.lt.s32.totalorder %s907_s16, %s907_s16 }
  0x18   : > { %p910_p0 = pnand %p908_p13, %p898_p12  ;;  %p917_p2 = por %p916_p7, %p915_p5 }
  0x1a   : > { %p911_p3 = pneg %p910_p0 }
  0x1c   : > { %p918_p6 = pnand %p917_p2, %p911_p3 }
  0x1e   : > { %921 = shalt.err (!%p918_p6)
}
  0x1f   : > { %s1093_s17 = smov 128   ;;  %s1094_s18 = smov 8  }
  0x20   : > { %s1470_s3 = sld [smem:[#allocation18_spill]]  ;;  %p42_p2 = scmp.ge.s32.totalorder %s40_s15, 2 }
  0x21   : > { %s49_s21 = sadd.s32 1, %s1078_s26  ;;  %p56_p6 = scmp.ne.s32.totalorder %s1078_s26, %s1074_s25 }
  0x22   : > { %p57_p9 = scmp.eq.s32.totalorder %s1090_s29, 0  ;;  %s1488_s15 = smov (%p42_p2, %s40_s15), 0 }
  0x23   : > { %1471 = sst [smem:[#allocation17_spill]] %s1488_s15  ;;  %p1473_p13 = scmp.eq.s32.totalorder %s1185_s30, 1 }
  0x24   : > { %p1233_p12 = por %p57_p9, %p56_p6  ;;  %s44_s12 = ssub.s32 %s1086_s28, %s1488_s15 }
  0x25   : > { %p1239_p0 = por %p1473_p13, %p56_p6  ;;  %p825_p3 = scmp.lt.s32.totalorder %s1090_s29, 2 }
  0x26   : > { %809 = dma.hbm_to_vmem [thread:$0]  (!%p1215_p11), %s1470_s3, 512, %s260_s13, [#allocation6], %s1093_s17, %s1093_s17, %s1094_s18  }
  0x27   : > { %p47_p11 = scmp.eq.s32.totalorder %s44_s12, 0  ;;  %s276_s13 = sand.u32 1, %s1078_s26  }
  0x28   : > { %s743_s14 = sshll.u32 %s276_s13, 3  ;;  %s744_s17 = sshll.u32 %s1086_s28, 7 }
  0x29   : > { %s1248_s16 = scalar_select %p47_p11, %s1078_s26, %s49_s21  }
  0x2a   : > { %s286_s20 = scalar_lea.hbm %s1450_s0, %s744_s17  ;;  %s280_s8 = scalar_lea.vmem [#allocation2], %s743_s14 }
  0x2b   : > { %s288_s3 = sshll.u32 %s280_s8, 4  ;;  %p1256_p5 = pnand %p825_p3, %p1233_p12  ;;  %s289_s3 = int_to_ptr.vmem [resolvable:$true] %s288_s3 }
  0x2c   : > { %s277_s15 = scalar_lea.sflag [#allocation3], %s276_s13  ;;  %s935_s12 = scalar_lea.vmem %s289_s3, 128 }
  0x2d   : > { %p924_p7 = pneg %p1256_p5  ;;  %p936_p2 = scmp.ne.s32.totalorder %s289_s3, %s935_s12 }
  0x2e   : > { %s1095_s21 = smov [#allocation2]  }
  0x2f   : > { %p938_p6 = pnand %p936_p2, %p924_p7  ;;  %s940_s28 = sshll.u32 %s1095_s21, 4  ;;  %s941_s28 = int_to_ptr.vmem [resolvable:$false] %s940_s28 }
  0x30   : > { %s942_s17 = scalar_lea.vmem %s941_s28, 256  ;;  %p943_p13 = scmp.lt.s32.totalorder %s289_s3, %s941_s28 }
  0x31   : > { %p939_p9 = pneg %p938_p6  ;;  %p944_p11 = scmp.lt.s32.totalorder %s942_s17, %s935_s12 }
  0x33   : > { %p945_p10 = por %p944_p11, %p943_p13 }
  0x35   : > { %p946_p1 = pnand %p945_p10, %p939_p9 }
  0x37   : > { %949 = shalt.err (!%p946_p1)
}
  0x38   : > { %813 = dma.hbm_to_vmem [thread:$0]  (!%p1256_p5), %s286_s20, 128, %s289_s3, %s277_s15  }
  0x39   : > { %297 = sbr.rel (%p1206_p8) target bundleno = 753 (0x2f1), region = 40  ;;  %s1267_s8 = sand.u32 (!%p1206_p8), 1, %s1074_s25  }
  0x3a   : > { %s746_s22 = sshll.u32 (!%p1206_p8), %s1267_s8, 3  ;;  %s300_s13 = scalar_lea.sflag (!%p1206_p8), [#allocation3], %s1267_s8 }
  0x3b   : > { %s303_s14 = scalar_lea.vmem (!%p1206_p8), [#allocation2], %s746_s22 }
  0x3e   : > { %1053 = dma.done.wait (%p1196_p4), %s300_s13, 128  }
  0x3f   : > { %1055 = vsyncadd (%p1196_p4), %s300_s13, 4294967168  ;;  %p1476_p1 = scmp.eq.s32.totalorder %s1185_s30, 0 }
  0x41   : > { %1057 = dma.done.wait (%p1476_p1), [#allocation6], 512   ;;  %p1477_p10 = pmov %p1476_p1 }
  0x42   : > { %vm349_vm0 = vcmask 261120   ;;  %v348_v0 = vld [vmem:[%s303_s14] sm:$0xff]  ;;  %v1096_v8 = vmov 0.0   ;;  %vm1097_vm1 = vmmov 0   ;;  %v381_v10 = vld [vmem:[#allocation5 + $0x8] sm:$0xff]  ;;  %v380_v11 = vld [vmem:[#allocation5] sm:$0xff] }
  0x43   : > { %1059 = vsyncadd (%p1477_p10), [#allocation6], 4294966784  ;;  %v350_v1 = vsel %vm349_vm0, %v348_v0, 0.0  ;;  %v383_v7 = vld [vmem:[#allocation5 + $0x18] sm:$0xff]  ;;  %783 = vmatprep.subr.mxu0 %v1096_v8  ;;  %v382_v9 = vld [vmem:[#allocation5 + $0x10] sm:$0xff]  ;;  %791 = vmatprep.mubr.msk.f32.mxu0 %vm1097_vm1, %v1096_v8  ;;  %s1289_s11 = sshll.u32 %s1267_s8, 5 }
  0x44   : > { %351 = vadd.xlane.f32.xlu0 %v350_v1  ;;  %784 = vmatpush3.msra.mxu0 %v383_v7  ;;  %v751_v16 = vld [vmem:[%s1451_s1] ss:$0 sm:$0xff]  ;;  %vm464_vm2 = vcmask 64512   ;;  %s1098_s19 = smov 80   ;;  %s1099_s20 = smov 96  }
  0x45   : > { %785 = vmatprep.subr.mxu0 %v1096_v8  ;;  %v752_v18 = vld [vmem:[%s1452_s2] ss:$0 sm:$0xff]  ;;  %s1295_s12 = scalar_lea.vmem [#allocation7], %s1289_s11  ;;  %s1100_s21 = smov 104  }
  0x46   : > { %786 = vmatpush3.msra.mxu0 %v382_v9  ;;  %v753_v21 = vld [vmem:[%s1454_s4] ss:$0 sm:$0xff]  ;;  %s1101_s17 = smov 88   ;;  %s1102_s22 = smov 72  }
  0x47   : > { %787 = vmatprep.subr.mxu0 %v1096_v8  ;;  %s1103_s13 = smov 64   ;;  %s1104_s14 = smov 120  }
  0x48   : > { %788 = vmatpush3.msra.mxu0 %v381_v10  ;;  %s1105_s3 = smov 56   ;;  %s1106_s28 = smov 112  }
  0x49   : > { %789 = vmatprep.subr.mxu0 %v1096_v8  ;;  %s1107_s9 = smov 48   ;;  %s1108_s10 = smov 40  }
  0x4a   : > { %790 = vmatpush3.msra.mxu0 %v380_v11  ;;  %s340_s15 = scalar_lea.vmem [#allocation8], %s1289_s11 }
  0x4b   : > { %s562_s18 = sshll.u32 %s340_s15, 4  ;;  %s1306_s18 = int_to_ptr.vmem [resolvable:$true] %s562_s18 }
  0xcd   : > { %v352_v2 = vpop.xlane.xlu0 %351 }
  0xce   : > { %v354_v3 = vmul.f32 0.03125, %v352_v2 }
  0xd0   : > { %v355_v4 = vsub.f32 %v348_v0, %v354_v3 }
  0xd2   : > { %v356_v5 = vmul.f32 %v355_v4, %v355_v4 }
  0xd4   : > { %v357_v6 = vsel %vm349_vm0, %v356_v5, 0.0 }
  0xd5   : > { %358 = vadd.xlane.f32.xlu0 %v357_v6 }
 0x15e   : > { %v359_v12 = vpop.xlane.xlu0 %358 }
 0x15f   : > { %v360_v13 = vmul.f32 0.03125, %v359_v12 }
 0x161   : > { %v361_v14 = vadd.f32 1e-05, %v360_v13 }
 0x163   : > { %894 = vrsqrt.f32 %v361_v14 }
 0x170   : > { %v895_v15 = vpop.eup %894 }
 0x171   : > { %v363_v17 = vmul.f32 %v895_v15, %v355_v4 }
 0x173   : > { %v371_v19 = vmul.f32 %v751_v16, %v363_v17 }
 0x175   : > { %v379_v20 = vadd.f32 %v752_v18, %v371_v19 }
 0x177   : > { %792 = vmatmul.mubr.msk.f32.vlgmr.msra.gmra.mxu0 %vm349_vm0, %v379_v20 }
 0x237   : > { %v460_v22 = vpop.f32.mrf.mxu0 }
 0x238   : > { %v461_v23 = vadd.f32 %v753_v21, %v460_v22 }
 0x239   : > { %v793_v24 = vpop.f32.mrf.mxu0 }
 0x23a   : > { %495 = vrot.lane.b32.xlu0 %v461_v23, %s1098_s19  ;;  %467 = vrot.lane.b32.xlu1 %v461_v23, %s1099_s20  ;;  %465 = vst.msk [vmem:[%s1295_s12] sm:$0xff] %vm464_vm2, %v461_v23  ;;  %s525_s19 = sand.u32 1, %s1185_s30   ;;  %s1304_s20 = sshll.u32 %s1082_s27, 9 }
 0x23b   : > { %s1318_s27 = scalar_lea.sflag [#allocation9], %s525_s19  ;;  %s950_s30 = scalar_lea.vmem %s1306_s18, 512 }
 0x23c   : > { %p951_p4 = scmp.ne.s32.totalorder %s1306_s18, %s950_s30 }
 0x23e   : > { %505 = vrot.lane.b32.xlu0 %v461_v23, %s1100_s21  ;;  %480 = vrot.lane.b32.xlu1 %v461_v23, %s1101_s17  ;;  %p952_p8 = pnand %p951_p4, %p1239_p0 }
 0x240   : > { %p953_p12 = pneg %p952_p8 }
 0x242   : > { %510 = vrot.lane.b32.xlu1 %v461_v23, %s1102_s22  ;;  %s1315_s22 = scalar_lea.hbm %s1456_s6, %s1304_s20 }
 0x246   : > { %471 = vrot.lane.b32.xlu1 %v461_v23, %s1103_s13  ;;  %s1109_s13 = smov [#allocation8]  }
 0x24a   : > { %475 = vrot.lane.b32.xlu1 %v461_v23, %s1104_s14  ;;  %s954_s14 = sshll.u32 %s1109_s13, 4  ;;  %s955_s14 = int_to_ptr.vmem [resolvable:$false] %s954_s14 }
 0x24b   : > { %p957_p3 = scmp.lt.s32.totalorder %s1306_s18, %s955_s14 }
 0x24e   : > { %485 = vrot.lane.b32.xlu1 %v461_v23, %s1105_s3  ;;  %s956_s3 = scalar_lea.vmem %s955_s14, 1024 }
 0x24f   : > { %p958_p5 = scmp.lt.s32.totalorder %s956_s3, %s950_s30 }
 0x251   : > { %p959_p7 = por %p958_p5, %p957_p3 }
 0x252   : > { %490 = vrot.lane.b32.xlu1 %v461_v23, %s1106_s28 }
 0x253   : > { %p960_p2 = pnand %p959_p7, %p953_p12 }
 0x256   : > { %500 = vrot.lane.b32.xlu1 %v461_v23, %s1107_s9 }
 0x25a   : > { %515 = vrot.lane.b32.xlu1 %v461_v23, %s1108_s10 }
 0x2ac   : > { %v496_v25 = vpop.permute.xlu0 %495  ;;  %v468_v26 = vpop.permute.xlu1 %467 }
 0x2ad   : > { %759 = vst.msk [vmem:[%s340_s15 + $0x10] sm:$0xff] %vm464_vm2, %v496_v25  ;;  %470 = vst.msk [vmem:[%s340_s15] sm:$0xff] %vm464_vm2, %v468_v26 }
 0x2b0   : > { %v506_v27 = vpop.permute.xlu0 %505  ;;  %v481_v28 = vpop.permute.xlu1 %480 }
 0x2b1   : > { %761 = vst.msk [vmem:[%s1295_s12 + $0x18] sm:$0xff] %vm464_vm2, %v506_v27  ;;  %756 = vst.msk [vmem:[%s340_s15 + $0x8] sm:$0xff] %vm464_vm2, %v481_v28 }
 0x2b4   : > { %v511_v29 = vpop.permute.xlu1 %510 }
 0x2b5   : > { %762 = vst.msk [vmem:[%s340_s15 + $0x18] sm:$0xff] %vm464_vm2, %v511_v29 }
 0x2b6   : > { %963 = shalt.err (!%p960_p2)
}
 0x2b7   : > { %s964_s28 = scalar_lea.hbm %s1315_s22, 512  ;;  %s968_s15 = scalar_lea.hbm %s1456_s6, 1024 }
 0x2b8   : > { %p965_p6 = scmp.ne.s32.totalorder %s1315_s22, %s964_s28  ;;  %p969_p11 = scmp.lt.s32.totalorder %s1315_s22, %s1456_s6 }
 0x2b9   : > { %p970_p1 = scmp.lt.s32.totalorder %s968_s15, %s964_s28 }
 0x2ba   : > { %p966_p9 = pnand %p965_p6, %p1239_p0 }
 0x2bb   : > { %p971_p10 = por %p970_p1, %p969_p11 }
 0x2bc   : > { %p967_p13 = pneg %p966_p9 }
 0x2be   : > { %p972_p4 = pnand %p971_p10, %p967_p13 }
 0x2c0   : > { %975 = shalt.err (!%p972_p4)
}
 0x2c1   : > { %s1110_s17 = smov 128   ;;  %s1111_s30 = smov 8   ;;  %v472_v30 = vpop.permute.xlu1 %471 }
 0x2c2   : > { %801 = dma.vmem_to_hbm [thread:$0]  (%p1239_p0), %s1306_s18, 512, %s1315_s22, %s1318_s27, %s1110_s17, %s1110_s17, %s1111_s30  }
 0x2c3   : > { %s1345_s13 = scalar_lea.vmem [#allocation10], %s1289_s11  ;;  %s545_s14 = sshll.u32 %s1295_s12, 4  ;;  %s1354_s14 = int_to_ptr.vmem [resolvable:$true] %s545_s14 }
 0x2c4   : > { %474 = vst.msk [vmem:[%s1345_s13] sm:$0xff] %vm464_vm2, %v472_v30  ;;  %s1360_s11 = scalar_lea.hbm %s1455_s5, %s1304_s20  ;;  %s521_s18 = scalar_lea.sflag [#allocation4], %s1267_s8 }
 0x2c5   : > { %v476_v31 = vpop.permute.xlu1 %475  ;;  %s976_s22 = scalar_lea.vmem %s1354_s14, 512  ;;  %s1112_s9 = smov [#allocation7]  }
 0x2c6   : > { %755 = vst.msk [vmem:[%s1295_s12 + $0x8] sm:$0xff] %vm464_vm2, %v476_v31  ;;  %p977_p8 = scmp.ne.s32.totalorder %s1354_s14, %s976_s22  ;;  %s980_s10 = sshll.u32 %s1112_s9, 4  ;;  %s981_s10 = int_to_ptr.vmem [resolvable:$false] %s980_s10 }
 0x2c7   : > { %s982_s15 = scalar_lea.vmem %s981_s10, 1024  ;;  %p983_p5 = scmp.lt.s32.totalorder %s1354_s14, %s981_s10 }
 0x2c8   : > { %p978_p12 = pnand %p977_p8, %p1239_p0  ;;  %p984_p7 = scmp.lt.s32.totalorder %s982_s15, %s976_s22 }
 0x2c9   : > { %v486_v32 = vpop.permute.xlu1 %485 }
 0x2ca   : > { %757 = vst.msk [vmem:[%s1345_s13 + $0x8] sm:$0xff] %vm464_vm2, %v486_v32  ;;  %p979_p3 = pneg %p978_p12  ;;  %p985_p2 = por %p984_p7, %p983_p5 }
 0x2cc   : > { %p986_p6 = pnand %p985_p2, %p979_p3 }
 0x2cd   : > { %v491_v33 = vpop.permute.xlu1 %490 }
 0x2ce   : > { %758 = vst.msk [vmem:[%s1295_s12 + $0x10] sm:$0xff] %vm464_vm2, %v491_v33 }
 0x2cf   : > { %989 = shalt.err (!%p986_p6)
}
 0x2d0   : > { %s990_s12 = scalar_lea.hbm %s1360_s11, 512  ;;  %s994_s21 = scalar_lea.hbm %s1455_s5, 1024 }
 0x2d1   : > { %p991_p9 = scmp.ne.s32.totalorder %s1360_s11, %s990_s12  ;;  %p995_p1 = scmp.lt.s32.totalorder %s1360_s11, %s1455_s5 }
 0x2d2   : > { %p996_p10 = scmp.lt.s32.totalorder %s994_s21, %s990_s12 }
 0x2d3   : > { %p992_p13 = pnand %p991_p9, %p1239_p0 }
 0x2d4   : > { %p997_p4 = por %p996_p10, %p995_p1 }
 0x2d5   : > { %p993_p11 = pneg %p992_p13 }
 0x2d7   : > { %p998_p8 = pnand %p997_p4, %p993_p11 }
 0x2d9   : > { %1001 = shalt.err (!%p998_p8)
}
 0x2da   : > { %800 = dma.vmem_to_hbm [thread:$0]  (%p1239_p0), %s1354_s14, 512, %s1360_s11, %s521_s18, %s1110_s17, %s1110_s17, %s1111_s30   ;;  %v501_v34 = vpop.permute.xlu1 %500 }
 0x2db   : > { %s579_s22 = sshll.u32 %s1345_s13, 4  ;;  %760 = vst.msk [vmem:[%s1345_s13 + $0x10] sm:$0xff] %vm464_vm2, %v501_v34  ;;  %s1397_s15 = scalar_lea.hbm %s1457_s7, %s1304_s20  ;;  %s1391_s22 = int_to_ptr.vmem [resolvable:$true] %s579_s22 }
 0x2dc   : > { %s1002_s12 = scalar_lea.vmem %s1391_s22, 512  ;;  %s1113_s14 = smov [#allocation10]  }
 0x2dd   : > { %p1003_p12 = scmp.ne.s32.totalorder %s1391_s22, %s1002_s12  ;;  %s1006_s11 = sshll.u32 %s1113_s14, 4  ;;  %s1007_s11 = int_to_ptr.vmem [resolvable:$false] %s1006_s11 }
 0x2de   : > { %v516_v35 = vpop.permute.xlu1 %515  ;;  %s1008_s18 = scalar_lea.vmem %s1007_s11, 1024  ;;  %p1009_p7 = scmp.lt.s32.totalorder %s1391_s22, %s1007_s11 }
 0x2df   : > { %763 = vst.msk [vmem:[%s1345_s13 + $0x18] sm:$0xff] %vm464_vm2, %v516_v35  ;;  %p1004_p3 = pnand %p1003_p12, %p1239_p0  ;;  %p1010_p2 = scmp.lt.s32.totalorder %s1008_s18, %s1002_s12 }
 0x2e1   : > { %p1005_p5 = pneg %p1004_p3  ;;  %p1011_p6 = por %p1010_p2, %p1009_p7 }
 0x2e3   : > { %p1012_p9 = pnand %p1011_p6, %p1005_p5 }
 0x2e5   : > { %1015 = shalt.err (!%p1012_p9)
}
 0x2e6   : > { %s1016_s20 = scalar_lea.hbm %s1397_s15, 512  ;;  %s1020_s19 = scalar_lea.hbm %s1457_s7, 1024 }
 0x2e7   : > { %p1017_p13 = scmp.ne.s32.totalorder %s1397_s15, %s1016_s20  ;;  %p1021_p10 = scmp.lt.s32.totalorder %s1397_s15, %s1457_s7 }
 0x2e8   : > { %p1022_p4 = scmp.lt.s32.totalorder %s1020_s19, %s1016_s20 }
 0x2e9   : > { %p1018_p11 = pnand %p1017_p13, %p1239_p0 }
 0x2ea   : > { %p1023_p8 = por %p1022_p4, %p1021_p10 }
 0x2eb   : > { %p1019_p1 = pneg %p1018_p11 }
 0x2ed   : > { %p1024_p12 = pnand %p1023_p8, %p1019_p1 }
 0x2ef   : > { %1027 = shalt.err (!%p1024_p12)
}
 0x2f0   : > { %802 = dma.vmem_to_hbm [thread:$0]  (%p1239_p0), %s1391_s22, 512, %s1397_s15, %s1318_s27, %s1110_s17, %s1110_s17, %s1111_s30  }
 0x2f1 PF: > { %s1478_s28 = sld [smem:[#allocation16_spill]]  ;;  %s594_s9 = sand.u32 1, %s1070_s24  }
 0x2f2   : > { %p1480_p5 = scmp.ge.s32.totalorder %s1090_s29, 2  ;;  %s595_s10 = scalar_lea.sflag [#allocation4], %s594_s9 }
 0x2f7   : > { %p1479_p3 = scmp.ne.s32.totalorder %s1478_s28, 0 }
 0x2f9   : > { %p815_p7 = pnand %p1480_p5, %p1479_p3 }
 0x2fb   : > { %p816_p2 = pneg %p815_p7 }
 0x2fd   : > { %1061 = dma.done.wait (%p816_p2), %s595_s10, 512  }
 0x2fe   : > { %1063 = vsyncadd (%p816_p2), %s595_s10, 4294966784  ;;  %s1481_s23 = sadd.s32 4294967294, %s1090_s29  }
 0x2ff   : > { %s603_s12 = sand.u32 1, %s1481_s23  }
 0x300   : > { %s604_s14 = scalar_lea.sflag [#allocation9], %s603_s12 }
 0x301   : > { %1065 = dma.done.wait (%p816_p2), %s604_s14, 1024  }
 0x302   : > { %1067 = vsyncadd (%p816_p2), %s604_s14, 4294966272  ;;  %s28_s29 = sadd.s32 1, %s1090_s29   ;;  %s1482_s27 = sld [smem:[#allocation15_spill]] }
 0x303   : > { %p25_p0 = scmp.ge.s32.totalorder %s28_s29, 4   ;;  %s1483_s28 = sld [smem:[#allocation17_spill]] }
 0x304   : > { %s1484_s24 = smov %s1074_s25  ;;  %s1485_s25 = smov %s1078_s26 }
 0x305   : > { %s1486_s26 = smov %s1248_s16  ;;  %27 = sbr.rel (!%p25_p0) target bundleno = 11 (0xb), region = 130 }
 0x30a   :  { %618 = vsyncpa [#allocation3], 1 }
 0x30b   :  { %620 = vsyncpa [#allocation3 + $0x1], 1 }
 0x30c   :  { %621 = vsyncpa [#allocation6], 1 }
 0x30d   :  { %622 = vsyncpa [#allocation4], 1 }
 0x30e   :  { %624 = vsyncpa [#allocation4 + $0x1], 1 }
 0x30f   :  { %625 = vsyncpa [#allocation9], 1 }
 0x310   :  { %627 = vsyncpa [#allocation9 + $0x1], 1 }

// kernel: tpu_custom_call.1
= control target key start
LH: loop header
LB: loop body
LE: loop exit
PB: predicated region body
PF: predicated region fallthrough
CT: control target
= control target key end

     0   :  { %s1450_s0 = inlined_call_operand.hbm [shape: f32[2,8,32], index: 0, kind: input, shape index: {}]   ;;  %s1451_s1 = inlined_call_operand.vmem [shape: f32[1,32], index: 1, kind: input, shape index: {}]   ;;  %s1452_s2 = inlined_call_operand.vmem [shape: f32[1,32], index: 2, kind: input, shape index: {}]   ;;  %s1453_s3 = inlined_call_operand.hbm [shape: f32[32,96], index: 3, kind: input, shape index: {}]   ;;  %s1454_s4 = inlined_call_operand.vmem [shape: f32[1,96], index: 4, kind: input, shape index: {}]   ;;  %s1455_s5 = inlined_call_operand.hbm [shape: f32[2,4,8,8], index: 5, kind: output, shape index: {0}]   ;;  %s1456_s6 = inlined_call_operand.hbm [shape: f32[2,4,8,8], index: 6, kind: output, shape index: {1}]   ;;  %s1457_s7 = inlined_call_operand.hbm [shape: f32[2,4,8,8], index: 7, kind: output, shape index: {2}]  }
   0x1   :  { %1463 = sst [smem:[#allocation18_spill]] %s1453_s3 }
   0x2   :  { %13 = vsyncpa [#allocation3], 0 }
   0x3   :  { %15 = vsyncpa [#allocation3 + $0x1], 0 }
   0x4   :  { %16 = vsyncpa [#allocation6], 0 }
   0x5   :  { %17 = vsyncpa [#allocation4], 0 }
   0x6   :  { %19 = vsyncpa [#allocation4 + $0x1], 0 }
   0x7   :  { %20 = vsyncpa [#allocation9], 0 }
   0x8   :  { %22 = vsyncpa [#allocation9 + $0x1], 0  ;;  %s1154_s24 = smov 0   ;;  %s1156_s25 = smov 0  }
   0x9   :  { %s1158_s26 = smov 0   ;;  %s1160_s27 = smov 0  }
   0xa   :  { %s1162_s28 = smov 0   ;;  %s1164_s29 = smov 0  }
   0xb LB: > { %1464 = sst [smem:[#allocation15_spill]] %s1086_s28  ;;  %s1185_s30 = sadd.s32 4294967295, %s1090_s29   ;;  %s1090_s29 = sphi %s1164_s29, %s28_s29   ;;  %s1086_s28 = sphi %s1162_s28, %s1483_s28   ;;  %s1082_s27 = sphi %s1160_s27, %s1482_s27   ;;  %s1078_s26 = sphi %s1158_s26, %s1486_s26   ;;  %s1074_s25 = sphi %s1156_s25, %s1485_s25   ;;  %s1070_s24 = sphi %s1154_s24, %s1484_s24  }
   0xc   : > { %s1458_s8 = sadd.s32 4294967294, %s1090_s29   ;;  %p62_p0 = scmp.ne.s32.totalorder %s1074_s25, %s1070_s24 }
   0xd   : > { %p1462_p1 = scmp.eq.s32.totalorder %s1185_s30, 0  ;;  %p178_p3 = scmp.eq.s32.totalorder %s1458_s8, 1 }
   0xe   : > { %p740_p5 = scmp.ge.s32.totalorder %s1090_s29, 1  ;;  %p241_p7 = scmp.lt.s32.totalorder %s1090_s29, 3 }
   0xf   : > { %p1196_p4 = por %p1462_p1, %p62_p0  ;;  %p1201_p6 = por %p178_p3, %p62_p0 }
  0x10   : > { %p1206_p8 = pnand %p740_p5, %p241_p7  ;;  %s1092_s12 = smov [#allocation5]  }
  0x11   : > { %s1466_s10 = scalar_select %p1201_p6, 1, 0 }
  0x12   : > { %s259_s13 = sshll.u32 %s1092_s12, 4  ;;  %p806_p9 = pneg %p1206_p8  ;;  %s260_s13 = int_to_ptr.vmem [resolvable:$true] %s259_s13 }
  0x13   : > { %1467 = sst [smem:[#allocation16_spill]] %s1466_s10  ;;  %s40_s15 = sadd.s32 1, %s1086_s28 }
  0x14   : > { %p1215_p11 = pnand %p806_p9, %p1462_p1  ;;  %s907_s16 = scalar_lea.vmem %s260_s13, 512 }
  0x15   : > { %p908_p13 = scmp.ne.s32.totalorder %s260_s13, %s907_s16  ;;  %p915_p5 = scmp.lt.s32.totalorder %s260_s13, %s260_s13 }
  0x16   : > { %p898_p12 = pneg %p1215_p11  ;;  %p916_p7 = scmp.lt.s32.totalorder %s907_s16, %s907_s16 }
  0x18   : > { %p910_p0 = pnand %p908_p13, %p898_p12  ;;  %p917_p2 = por %p916_p7, %p915_p5 }
  0x1a   : > { %p911_p3 = pneg %p910_p0 }
  0x1c   : > { %p918_p6 = pnand %p917_p2, %p911_p3 }
  0x1e   : > { %921 = shalt.err (!%p918_p6)
}
  0x1f   : > { %s1093_s17 = smov 128   ;;  %s1094_s18 = smov 8  }
  0x20   : > { %s1470_s3 = sld [smem:[#allocation18_spill]]  ;;  %p42_p2 = scmp.ge.s32.totalorder %s40_s15, 2 }
  0x21   : > { %s49_s21 = sadd.s32 1, %s1078_s26  ;;  %p56_p6 = scmp.ne.s32.totalorder %s1078_s26, %s1074_s25 }
  0x22   : > { %p57_p9 = scmp.eq.s32.totalorder %s1090_s29, 0  ;;  %s1488_s15 = smov (%p42_p2, %s40_s15), 0 }
  0x23   : > { %1471 = sst [smem:[#allocation17_spill]] %s1488_s15  ;;  %p1473_p13 = scmp.eq.s32.totalorder %s1185_s30, 1 }
  0x24   : > { %p1233_p12 = por %p57_p9, %p56_p6  ;;  %s44_s12 = ssub.s32 %s1086_s28, %s1488_s15 }
  0x25   : > { %p1239_p0 = por %p1473_p13, %p56_p6  ;;  %p825_p3 = scmp.lt.s32.totalorder %s1090_s29, 2 }
  0x26   : > { %809 = dma.hbm_to_vmem [thread:$0]  (!%p1215_p11), %s1470_s3, 512, %s260_s13, [#allocation6], %s1093_s17, %s1093_s17, %s1094_s18  }
  0x27   : > { %p47_p11 = scmp.eq.s32.totalorder %s44_s12, 0  ;;  %s276_s13 = sand.u32 1, %s1078_s26  }
  0x28   : > { %s743_s14 = sshll.u32 %s276_s13, 3  ;;  %s744_s17 = sshll.u32 %s1086_s28, 7 }
  0x29   : > { %s1248_s16 = scalar_select %p47_p11, %s1078_s26, %s49_s21  }
  0x2a   : > { %s286_s20 = scalar_lea.hbm %s1450_s0, %s744_s17  ;;  %s280_s8 = scalar_lea.vmem [#allocation2], %s743_s14 }
  0x2b   : > { %s288_s3 = sshll.u32 %s280_s8, 4  ;;  %p1256_p5 = pnand %p825_p3, %p1233_p12  ;;  %s289_s3 = int_to_ptr.vmem [resolvable:$true] %s288_s3 }
  0x2c   : > { %s277_s15 = scalar_lea.sflag [#allocation3], %s276_s13  ;;  %s935_s12 = scalar_lea.vmem %s289_s3, 128 }
  0x2d   : > { %p924_p7 = pneg %p1256_p5  ;;  %p936_p2 = scmp.ne.s32.totalorder %s289_s3, %s935_s12 }
  0x2e   : > { %s1095_s21 = smov [#allocation2]  }
  0x2f   : > { %p938_p6 = pnand %p936_p2, %p924_p7  ;;  %s940_s28 = sshll.u32 %s1095_s21, 4  ;;  %s941_s28 = int_to_ptr.vmem [resolvable:$false] %s940_s28 }
  0x30   : > { %s942_s17 = scalar_lea.vmem %s941_s28, 256  ;;  %p943_p13 = scmp.lt.s32.totalorder %s289_s3, %s941_s28 }
  0x31   : > { %p939_p9 = pneg %p938_p6  ;;  %p944_p11 = scmp.lt.s32.totalorder %s942_s17, %s935_s12 }
  0x33   : > { %p945_p10 = por %p944_p11, %p943_p13 }
  0x35   : > { %p946_p1 = pnand %p945_p10, %p939_p9 }
  0x37   : > { %949 = shalt.err (!%p946_p1)
}
  0x38   : > { %813 = dma.hbm_to_vmem [thread:$0]  (!%p1256_p5), %s286_s20, 128, %s289_s3, %s277_s15  }
  0x39   : > { %297 = sbr.rel (%p1206_p8) target bundleno = 753 (0x2f1), region = 40  ;;  %s1267_s8 = sand.u32 (!%p1206_p8), 1, %s1074_s25  }
  0x3a   : > { %s746_s22 = sshll.u32 (!%p1206_p8), %s1267_s8, 3  ;;  %s300_s13 = scalar_lea.sflag (!%p1206_p8), [#allocation3], %s1267_s8 }
  0x3b   : > { %s303_s14 = scalar_lea.vmem (!%p1206_p8), [#allocation2], %s746_s22 }
  0x3e   : > { %1053 = dma.done.wait (%p1196_p4), %s300_s13, 128  }
  0x3f   : > { %1055 = vsyncadd (%p1196_p4), %s300_s13, 4294967168  ;;  %p1476_p1 = scmp.eq.s32.totalorder %s1185_s30, 0 }
  0x41   : > { %1057 = dma.done.wait (%p1476_p1), [#allocation6], 512   ;;  %p1477_p10 = pmov %p1476_p1 }
  0x42   : > { %vm349_vm0 = vcmask 261120   ;;  %v348_v0 = vld [vmem:[%s303_s14] sm:$0xff]  ;;  %v1096_v8 = vmov 0.0   ;;  %vm1097_vm1 = vmmov 0   ;;  %v381_v10 = vld [vmem:[#allocation5 + $0x8] sm:$0xff]  ;;  %v380_v11 = vld [vmem:[#allocation5] sm:$0xff] }
  0x43   : > { %1059 = vsyncadd (%p1477_p10), [#allocation6], 4294966784  ;;  %v350_v1 = vsel %vm349_vm0, %v348_v0, 0.0  ;;  %v383_v7 = vld [vmem:[#allocation5 + $0x18] sm:$0xff]  ;;  %783 = vmatprep.subr.mxu0 %v1096_v8  ;;  %v382_v9 = vld [vmem:[#allocation5 + $0x10] sm:$0xff]  ;;  %791 = vmatprep.mubr.msk.f32.mxu0 %vm1097_vm1, %v1096_v8  ;;  %s1289_s11 = sshll.u32 %s1267_s8, 5 }
  0x44   : > { %351 = vadd.xlane.f32.xlu0 %v350_v1  ;;  %784 = vmatpush3.msra.mxu0 %v383_v7  ;;  %v751_v16 = vld [vmem:[%s1451_s1] ss:$0 sm:$0xff]  ;;  %vm464_vm2 = vcmask 64512   ;;  %s1098_s19 = smov 80   ;;  %s1099_s20 = smov 96  }
  0x45   : > { %785 = vmatprep.subr.mxu0 %v1096_v8  ;;  %v752_v18 = vld [vmem:[%s1452_s2] ss:$0 sm:$0xff]  ;;  %s1295_s12 = scalar_lea.vmem [#allocation7], %s1289_s11  ;;  %s1100_s21 = smov 104  }
  0x46   : > { %786 = vmatpush3.msra.mxu0 %v382_v9  ;;  %v753_v21 = vld [vmem:[%s1454_s4] ss:$0 sm:$0xff]  ;;  %s1101_s17 = smov 88   ;;  %s1102_s22 = smov 72  }
  0x47   : > { %787 = vmatprep.subr.mxu0 %v1096_v8  ;;  %s1103_s13 = smov 64   ;;  %s1104_s14 = smov 120  }
  0x48   : > { %788 = vmatpush3.msra.mxu0 %v381_v10  ;;  %s1105_s3 = smov 56   ;;  %s1106_s28 = smov 112  }
  0x49   : > { %789 = vmatprep.subr.mxu0 %v1096_v8  ;;  %s1107_s9 = smov 48   ;;  %s1108_s10 = smov 40  }
  0x4a   : > { %790 = vmatpush3.msra.mxu0 %v380_v11  ;;  %s340_s15 = scalar_lea.vmem [#allocation8], %s1289_s11 }
  0x4b   : > { %s562_s18 = sshll.u32 %s340_s15, 4  ;;  %s1306_s18 = int_to_ptr.vmem [resolvable:$true] %s562_s18 }
  0xcd   : > { %v352_v2 = vpop.xlane.xlu0 %351 }
  0xce   : > { %v354_v3 = vmul.f32 0.03125, %v352_v2 }
  0xd0   : > { %v355_v4 = vsub.f32 %v348_v0, %v354_v3 }
  0xd2   : > { %v356_v5 = vmul.f32 %v355_v4, %v355_v4 }
  0xd4   : > { %v357_v6 = vsel %vm349_vm0, %v356_v5, 0.0 }
  0xd5   : > { %358 = vadd.xlane.f32.xlu0 %v357_v6 }
 0x15e   : > { %v359_v12 = vpop.xlane.xlu0 %358 }
 0x15f   : > { %v360_v13 = vmul.f32 0.03125, %v359_v12 }
 0x161   : > { %v361_v14 = vadd.f32 1e-05, %v360_v13 }
 0x163   : > { %894 = vrsqrt.f32 %v361_v14 }
 0x170   : > { %v895_v15 = vpop.eup %894 }
 0x171   : > { %v363_v17 = vmul.f32 %v895_v15, %v355_v4 }
 0x173   : > { %v371_v19 = vmul.f32 %v751_v16, %v363_v17 }
 0x175   : > { %v379_v20 = vadd.f32 %v752_v18, %v371_v19 }
 0x177   : > { %792 = vmatmul.mubr.msk.f32.vlgmr.msra.gmra.mxu0 %vm349_vm0, %v379_v20 }
 0x237   : > { %v460_v22 = vpop.f32.mrf.mxu0 }
 0x238   : > { %v461_v23 = vadd.f32 %v753_v21, %v460_v22 }
 0x239   : > { %v793_v24 = vpop.f32.mrf.mxu0 }
 0x23a   : > { %495 = vrot.lane.b32.xlu0 %v461_v23, %s1098_s19  ;;  %467 = vrot.lane.b32.xlu1 %v461_v23, %s1099_s20  ;;  %465 = vst.msk [vmem:[%s1295_s12] sm:$0xff] %vm464_vm2, %v461_v23  ;;  %s525_s19 = sand.u32 1, %s1185_s30   ;;  %s1304_s20 = sshll.u32 %s1082_s27, 9 }
 0x23b   : > { %s1318_s27 = scalar_lea.sflag [#allocation9], %s525_s19  ;;  %s950_s30 = scalar_lea.vmem %s1306_s18, 512 }
 0x23c   : > { %p951_p4 = scmp.ne.s32.totalorder %s1306_s18, %s950_s30 }
 0x23e   : > { %505 = vrot.lane.b32.xlu0 %v461_v23, %s1100_s21  ;;  %480 = vrot.lane.b32.xlu1 %v461_v23, %s1101_s17  ;;  %p952_p8 = pnand %p951_p4, %p1239_p0 }
 0x240   : > { %p953_p12 = pneg %p952_p8 }
 0x242   : > { %510 = vrot.lane.b32.xlu1 %v461_v23, %s1102_s22  ;;  %s1315_s22 = scalar_lea.hbm %s1456_s6, %s1304_s20 }
 0x246   : > { %471 = vrot.lane.b32.xlu1 %v461_v23, %s1103_s13  ;;  %s1109_s13 = smov [#allocation8]  }
 0x24a   : > { %475 = vrot.lane.b32.xlu1 %v461_v23, %s1104_s14  ;;  %s954_s14 = sshll.u32 %s1109_s13, 4  ;;  %s955_s14 = int_to_ptr.vmem [resolvable:$false] %s954_s14 }
 0x24b   : > { %p957_p3 = scmp.lt.s32.totalorder %s1306_s18, %s955_s14 }
 0x24e   : > { %485 = vrot.lane.b32.xlu1 %v461_v23, %s1105_s3  ;;  %s956_s3 = scalar_lea.vmem %s955_s14, 1024 }
 0x24f   : > { %p958_p5 = scmp.lt.s32.totalorder %s956_s3, %s950_s30 }
 0x251   : > { %p959_p7 = por %p958_p5, %p957_p3 }
 0x252   : > { %490 = vrot.lane.b32.xlu1 %v461_v23, %s1106_s28 }
 0x253   : > { %p960_p2 = pnand %p959_p7, %p953_p12 }
 0x256   : > { %500 = vrot.lane.b32.xlu1 %v461_v23, %s1107_s9 }
 0x25a   : > { %515 = vrot.lane.b32.xlu1 %v461_v23, %s1108_s10 }
 0x2ac   : > { %v496_v25 = vpop.permute.xlu0 %495  ;;  %v468_v26 = vpop.permute.xlu1 %467 }
 0x2ad   : > { %759 = vst.msk [vmem:[%s340_s15 + $0x10] sm:$0xff] %vm464_vm2, %v496_v25  ;;  %470 = vst.msk [vmem:[%s340_s15] sm:$0xff] %vm464_vm2, %v468_v26 }
 0x2b0   : > { %v506_v27 = vpop.permute.xlu0 %505  ;;  %v481_v28 = vpop.permute.xlu1 %480 }
 0x2b1   : > { %761 = vst.msk [vmem:[%s1295_s12 + $0x18] sm:$0xff] %vm464_vm2, %v506_v27  ;;  %756 = vst.msk [vmem:[%s340_s15 + $0x8] sm:$0xff] %vm464_vm2, %v481_v28 }
 0x2b4   : > { %v511_v29 = vpop.permute.xlu1 %510 }
 0x2b5   : > { %762 = vst.msk [vmem:[%s340_s15 + $0x18] sm:$0xff] %vm464_vm2, %v511_v29 }
 0x2b6   : > { %963 = shalt.err (!%p960_p2)
}
 0x2b7   : > { %s964_s28 = scalar_lea.hbm %s1315_s22, 512  ;;  %s968_s15 = scalar_lea.hbm %s1456_s6, 1024 }
 0x2b8   : > { %p965_p6 = scmp.ne.s32.totalorder %s1315_s22, %s964_s28  ;;  %p969_p11 = scmp.lt.s32.totalorder %s1315_s22, %s1456_s6 }
 0x2b9   : > { %p970_p1 = scmp.lt.s32.totalorder %s968_s15, %s964_s28 }
 0x2ba   : > { %p966_p9 = pnand %p965_p6, %p1239_p0 }
 0x2bb   : > { %p971_p10 = por %p970_p1, %p969_p11 }
 0x2bc   : > { %p967_p13 = pneg %p966_p9 }
 0x2be   : > { %p972_p4 = pnand %p971_p10, %p967_p13 }
 0x2c0   : > { %975 = shalt.err (!%p972_p4)
}
 0x2c1   : > { %s1110_s17 = smov 128   ;;  %s1111_s30 = smov 8   ;;  %v472_v30 = vpop.permute.xlu1 %471 }
 0x2c2   : > { %801 = dma.vmem_to_hbm [thread:$0]  (%p1239_p0), %s1306_s18, 512, %s1315_s22, %s1318_s27, %s1110_s17, %s1110_s17, %s1111_s30  }
 0x2c3   : > { %s1345_s13 = scalar_lea.vmem [#allocation10], %s1289_s11  ;;  %s545_s14 = sshll.u32 %s1295_s12, 4  ;;  %s1354_s14 = int_to_ptr.vmem [resolvable:$true] %s545_s14 }
 0x2c4   : > { %474 = vst.msk [vmem:[%s1345_s13] sm:$0xff] %vm464_vm2, %v472_v30  ;;  %s1360_s11 = scalar_lea.hbm %s1455_s5, %s1304_s20  ;;  %s521_s18 = scalar_lea.sflag [#allocation4], %s1267_s8 }
 0x2c5   : > { %v476_v31 = vpop.permute.xlu1 %475  ;;  %s976_s22 = scalar_lea.vmem %s1354_s14, 512  ;;  %s1112_s9 = smov [#allocation7]  }
 0x2c6   : > { %755 = vst.msk [vmem:[%s1295_s12 + $0x8] sm:$0xff] %vm464_vm2, %v476_v31  ;;  %p977_p8 = scmp.ne.s32.totalorder %s1354_s14, %s976_s22  ;;  %s980_s10 = sshll.u32 %s1112_s9, 4  ;;  %s981_s10 = int_to_ptr.vmem [resolvable:$false] %s980_s10 }
 0x2c7   : > { %s982_s15 = scalar_lea.vmem %s981_s10, 1024  ;;  %p983_p5 = scmp.lt.s32.totalorder %s1354_s14, %s981_s10 }
 0x2c8   : > { %p978_p12 = pnand %p977_p8, %p1239_p0  ;;  %p984_p7 = scmp.lt.s32.totalorder %s982_s15, %s976_s22 }
 0x2c9   : > { %v486_v32 = vpop.permute.xlu1 %485 }
 0x2ca   : > { %757 = vst.msk [vmem:[%s1345_s13 + $0x8] sm:$0xff] %vm464_vm2, %v486_v32  ;;  %p979_p3 = pneg %p978_p12  ;;  %p985_p2 = por %p984_p7, %p983_p5 }
 0x2cc   : > { %p986_p6 = pnand %p985_p2, %p979_p3 }
 0x2cd   : > { %v491_v33 = vpop.permute.xlu1 %490 }
 0x2ce   : > { %758 = vst.msk [vmem:[%s1295_s12 + $0x10] sm:$0xff] %vm464_vm2, %v491_v33 }
 0x2cf   : > { %989 = shalt.err (!%p986_p6)
}
 0x2d0   : > { %s990_s12 = scalar_lea.hbm %s1360_s11, 512  ;;  %s994_s21 = scalar_lea.hbm %s1455_s5, 1024 }
 0x2d1   : > { %p991_p9 = scmp.ne.s32.totalorder %s1360_s11, %s990_s12  ;;  %p995_p1 = scmp.lt.s32.totalorder %s1360_s11, %s1455_s5 }
 0x2d2   : > { %p996_p10 = scmp.lt.s32.totalorder %s994_s21, %s990_s12 }
 0x2d3   : > { %p992_p13 = pnand %p991_p9, %p1239_p0 }
 0x2d4   : > { %p997_p4 = por %p996_p10, %p995_p1 }
 0x2d5   : > { %p993_p11 = pneg %p992_p13 }
 0x2d7   : > { %p998_p8 = pnand %p997_p4, %p993_p11 }
 0x2d9   : > { %1001 = shalt.err (!%p998_p8)
}
 0x2da   : > { %800 = dma.vmem_to_hbm [thread:$0]  (%p1239_p0), %s1354_s14, 512, %s1360_s11, %s521_s18, %s1110_s17, %s1110_s17, %s1111_s30   ;;  %v501_v34 = vpop.permute.xlu1 %500 }
 0x2db   : > { %s579_s22 = sshll.u32 %s1345_s13, 4  ;;  %760 = vst.msk [vmem:[%s1345_s13 + $0x10] sm:$0xff] %vm464_vm2, %v501_v34  ;;  %s1397_s15 = scalar_lea.hbm %s1457_s7, %s1304_s20  ;;  %s1391_s22 = int_to_ptr.vmem [resolvable:$true] %s579_s22 }
 0x2dc   : > { %s1002_s12 = scalar_lea.vmem %s1391_s22, 512  ;;  %s1113_s14 = smov [#allocation10]  }
 0x2dd   : > { %p1003_p12 = scmp.ne.s32.totalorder %s1391_s22, %s1002_s12  ;;  %s1006_s11 = sshll.u32 %s1113_s14, 4  ;;  %s1007_s11 = int_to_ptr.vmem [resolvable:$false] %s1006_s11 }
 0x2de   : > { %v516_v35 = vpop.permute.xlu1 %515  ;;  %s1008_s18 = scalar_lea.vmem %s1007_s11, 1024  ;;  %p1009_p7 = scmp.lt.s32.totalorder %s1391_s22, %s1007_s11 }
 0x2df   : > { %763 = vst.msk [vmem:[%s1345_s13 + $0x18] sm:$0xff] %vm464_vm2, %v516_v35  ;;  %p1004_p3 = pnand %p1003_p12, %p1239_p0  ;;  %p1010_p2 = scmp.lt.s32.totalorder %s1008_s18, %s1002_s12 }
 0x2e1   : > { %p1005_p5 = pneg %p1004_p3  ;;  %p1011_p6 = por %p1010_p2, %p1009_p7 }
 0x2e3   : > { %p1012_p9 = pnand %p1011_p6, %p1005_p5 }
 0x2e5   : > { %1015 = shalt.err (!%p1012_p9)
}
 0x2e6   : > { %s1016_s20 = scalar_lea.hbm %s1397_s15, 512  ;;  %s1020_s19 = scalar_lea.hbm %s1457_s7, 1024 }
 0x2e7   : > { %p1017_p13 = scmp.ne.s32.totalorder %s1397_s15, %s1016_s20  ;;  %p1021_p10 = scmp.lt.s32.totalorder %s1397_s15, %s1457_s7 }
 0x2e8   : > { %p1022_p4 = scmp.lt.s32.totalorder %s1020_s19, %s1016_s20 }
 0x2e9   : > { %p1018_p11 = pnand %p1017_p13, %p1239_p0 }
 0x2ea   : > { %p1023_p8 = por %p1022_p4, %p1021_p10 }
 0x2eb   : > { %p1019_p1 = pneg %p1018_p11 }
 0x2ed   : > { %p1024_p12 = pnand %p1023_p8, %p1019_p1 }
 0x2ef   : > { %1027 = shalt.err (!%p1024_p12)
}
 0x2f0   : > { %802 = dma.vmem_to_hbm [thread:$0]  (%p1239_p0), %s1391_s22, 512, %s1397_s15, %s1318_s27, %s1110_s17, %s1110_s17, %s1111_s30  }
 0x2f1 PF: > { %s1478_s28 = sld [smem:[#allocation16_spill]]  ;;  %s594_s9 = sand.u32 1, %s1070_s24  }
 0x2f2   : > { %p1480_p5 = scmp.ge.s32.totalorder %s1090_s29, 2  ;;  %s595_s10 = scalar_lea.sflag [#allocation4], %s594_s9 }
 0x2f7   : > { %p1479_p3 = scmp.ne.s32.totalorder %s1478_s28, 0 }
 0x2f9   : > { %p815_p7 = pnand %p1480_p5, %p1479_p3 }
 0x2fb   : > { %p816_p2 = pneg %p815_p7 }
 0x2fd   : > { %1061 = dma.done.wait (%p816_p2), %s595_s10, 512  }
 0x2fe   : > { %1063 = vsyncadd (%p816_p2), %s595_s10, 4294966784  ;;  %s1481_s23 = sadd.s32 4294967294, %s1090_s29  }
 0x2ff   : > { %s603_s12 = sand.u32 1, %s1481_s23  }
 0x300   : > { %s604_s14 = scalar_lea.sflag [#allocation9], %s603_s12 }
 0x301   : > { %1065 = dma.done.wait (%p816_p2), %s604_s14, 1024  }
 0x302   : > { %1067 = vsyncadd (%p816_p2), %s604_s14, 4294966272  ;;  %s28_s29 = sadd.s32 1, %s1090_s29   ;;  %s1482_s27 = sld [smem:[#allocation15_spill]] }
 0x303   : > { %p25_p0 = scmp.ge.s32.totalorder %s28_s29, 4   ;;  %s1483_s28 = sld [smem:[#allocation17_spill]] }
 0x304   : > { %s1484_s24 = smov %s1074_s25  ;;  %s1485_s25 = smov %s1078_s26 }
 0x305   : > { %s1486_s26 = smov %s1248_s16  ;;  %27 = sbr.rel (!%p25_p0) target bundleno = 11 (0xb), region = 130 }
 0x30a   :  { %618 = vsyncpa [#allocation3], 1 }
 0x30b   :  { %620 = vsyncpa [#allocation3 + $0x1], 1 }
 0x30c   :  { %621 = vsyncpa [#allocation6], 1 }
 0x30d   :  { %622 = vsyncpa [#allocation4], 1 }
 0x30e   :  { %624 = vsyncpa [#allocation4 + $0x1], 1 }
 0x30f   :  { %625 = vsyncpa [#allocation9], 1 }
 0x310   :  { %627 = vsyncpa [#allocation9 + $0x1], 1 }

</bundles_post_ra>
